<compile_context>
chip_gen: v7x
topology: tpu7x:2x2x1
jax: 0.10.0
libtpu: 0.0.40
codegen_flags: <defaults>
</compile_context>

<pallas_src>
import functools
import math

import jax
import jax.numpy as jnp
import numpy as np
from jax.experimental import pallas as pl
from jax.experimental.pallas import tpu as pltpu


# ----------------------------------------------------------------------------
# Shared math helpers (pure jnp -> usable both inside the kernel and in the
# pure-JAX reference).
# ----------------------------------------------------------------------------
def _layer_norm(x, w, b, eps=1e-5):
    mu = jnp.mean(x, axis=-1, keepdims=True)
    var = jnp.mean(jnp.square(x - mu), axis=-1, keepdims=True)
    return (x - mu) * jax.lax.rsqrt(var + eps) * w + b


# contract the LAST dim of both operands (A @ B^T) -- standard MXU NT pattern.
_NT = (((1,), (1,)), ((), ()))


# ----------------------------------------------------------------------------
# Fused kernel: all encoder layers + policy head for one batch element.
# ----------------------------------------------------------------------------
def fused_policy_kernel(x_ref,
                        wqkv_ref, bqkv_ref, wo_ref, bo_ref,
                        ln1w_ref, ln1b_ref,
                        w1_ref, b1_ref, w2t_ref, b2_ref,
                        ln2w_ref, ln2b_ref,
                        fc1wt_ref, fc1bt_ref, noise_ref,
                        o_ref, *, head_num, head_dim, num_path):
    f32, bf16 = jnp.float32, jnp.bfloat16
    scale = 1.0 / math.sqrt(head_dim)
    layer_num = wqkv_ref.shape[0]

    h = x_ref[0]                       # (S, D) f32, resident for the whole net
    S, D = h.shape

    for li in range(layer_num):        # static unroll over encoder layers
        # ---- self-attention: fused QKV projection (one MXU pass, 3D lanes) --
        qkv = jnp.dot(h.astype(bf16), wqkv_ref[li],
                      preferred_element_type=f32) + bqkv_ref[li]     # (S, 3D)
        q = qkv[:, 0:D].astype(bf16)
        k = qkv[:, D:2 * D].astype(bf16)
        v = qkv[:, 2 * D:3 * D].astype(bf16)

        # per-head scores stacked on the sublane axis -> single softmax pass
        s_blocks = []
        for hh in range(head_num):
            lo = hh * head_dim
            s_blocks.append(jax.lax.dot_general(
                q[:, lo:lo + head_dim], k[:, lo:lo + head_dim], _NT,
                preferred_element_type=f32))                         # (S, S)
        s_all = jnp.concatenate(s_blocks, axis=0) * scale            # (H*S, S)
        s_all = s_all - jnp.max(s_all, axis=-1, keepdims=True)
        p_all = jnp.exp(s_all)
        p_all = (p_all / jnp.sum(p_all, axis=-1, keepdims=True)).astype(bf16)

        head_outs = []
        for hh in range(head_num):
            lo = hh * head_dim
            head_outs.append(jnp.dot(p_all[hh * S:(hh + 1) * S, :],
                                     v[:, lo:lo + head_dim],
                                     preferred_element_type=f32))    # (S, hd)
        attn = jnp.concatenate(head_outs, axis=-1)                   # (S, D)
        attn = jnp.dot(attn.astype(bf16), wo_ref[li],
                       preferred_element_type=f32) + bo_ref[li]

        x1 = _layer_norm(h + attn, ln1w_ref[li], ln1b_ref[li])

        # ---- FFN: w1 (D,F), w2 kept lane-dense as (D,F) and contracted NT ---
        h1 = jnp.dot(x1.astype(bf16), w1_ref[li],
                     preferred_element_type=f32) + b1_ref[li]        # (S, F)
        h1 = jnp.maximum(h1, 0.0)                                    # relu
        h2 = jax.lax.dot_general(h1.astype(bf16), w2t_ref[li], _NT,
                                 preferred_element_type=f32) + b2_ref[li]
        h = _layer_norm(x1 + h2, ln2w_ref[li], ln2b_ref[li])

    # ---- policy head, written directly in the (3, P) output layout ----------
    hP = h[0:num_path, :].astype(bf16)                               # (P, D)
    yT = jax.lax.dot_general(fc1wt_ref[...], hP, _NT,
                             preferred_element_type=f32) + fc1bt_ref[...]  # (2, P)
    mean = yT[0:1, :]
    std = jnp.exp(yT[1:2, :])
    action = jnp.tanh(mean + std * noise_ref[0])                     # (1, P)
    o_ref[0] = jnp.concatenate([mean, std, action], axis=0)          # (3, P)


# ----------------------------------------------------------------------------
# Wrapper: stack/transposes the per-layer params once, one pallas_call.
# ----------------------------------------------------------------------------
def _prepare_fused_params(layer_params, fc1_w, fc1_b):
    bf16 = jnp.bfloat16
    stack = lambda key: jnp.stack([p[key] for p in layer_params], axis=0)
    wqkv = jnp.stack([jnp.concatenate([p["wq"], p["wk"], p["wv"]], axis=1)
                      for p in layer_params], axis=0).astype(bf16)   # (L, D, 3D)
    bqkv = jnp.stack([jnp.concatenate([p["bq"], p["bk"], p["bv"]], axis=1)
                      for p in layer_params], axis=0)                # (L, 1, 3D)
    w2t = jnp.stack([p["w2"].T for p in layer_params],
                    axis=0).astype(bf16)                             # (L, D, F)
    return dict(
        wqkv=wqkv, bqkv=bqkv,
        wo=stack("wo").astype(bf16), bo=stack("bo"),
        ln1w=stack("ln1_w"), ln1b=stack("ln1_b"),
        w1=stack("w1").astype(bf16), b1=stack("b1"),
        w2t=w2t, b2=stack("b2"),
        ln2w=stack("ln2_w"), ln2b=stack("ln2_b"),
        fc1wt=fc1_w.T.astype(bf16),       # (2, D) -> head writes (3, P) directly
        fc1bt=fc1_b.T,                    # (2, 1)
    )


@functools.partial(jax.jit, static_argnums=(5, 6))
def transformer_policy_net_forward(x, layer_params, fc1_w, fc1_b, noise,
                                   head_num, num_path):
    B, S, D = x.shape
    L = len(layer_params)
    F = layer_params[0]["w1"].shape[1]
    head_dim = D // head_num
    P = num_path
    assert P <= S, "num_path must not exceed the sequence length"

    fp = _prepare_fused_params(layer_params, fc1_w, fc1_b)

    def c3(b):          # weights: constant block index -> DMA'd once, resident
        return (0, 0, 0)

    def c2(b):
        return (0, 0)

    in_specs = [
        pl.BlockSpec((1, S, D), lambda b: (b, 0, 0)),       # x
        pl.BlockSpec((L, D, 3 * D), c3),                    # wqkv (bf16)
        pl.BlockSpec((L, 1, 3 * D), c3),                    # bqkv
        pl.BlockSpec((L, D, D), c3),                        # wo   (bf16)
        pl.BlockSpec((L, 1, D), c3),                        # bo
        pl.BlockSpec((L, 1, D), c3),                        # ln1_w
        pl.BlockSpec((L, 1, D), c3),                        # ln1_b
        pl.BlockSpec((L, D, F), c3),                        # w1   (bf16)
        pl.BlockSpec((L, 1, F), c3),                        # b1
        pl.BlockSpec((L, D, F), c3),                        # w2^T (bf16, lane-dense)
        pl.BlockSpec((L, 1, D), c3),                        # b2
        pl.BlockSpec((L, 1, D), c3),                        # ln2_w
        pl.BlockSpec((L, 1, D), c3),                        # ln2_b
        pl.BlockSpec((2, D), c2),                           # fc1^T (bf16)
        pl.BlockSpec((2, 1), c2),                           # fc1 bias (2,1)
        pl.BlockSpec((1, 1, P), lambda b: (b, 0, 0)),       # noise
    ]
    out_spec = pl.BlockSpec((1, 3, P), lambda b: (b, 0, 0))

    kernel = functools.partial(fused_policy_kernel, head_num=head_num,
                               head_dim=head_dim, num_path=num_path)
    return pl.pallas_call(
        kernel,
        out_shape=jax.ShapeDtypeStruct((B, 3, P), jnp.float32),
        grid_spec=pltpu.PrefetchScalarGridSpec(
            num_scalar_prefetch=0,
            grid=(B,),
            in_specs=in_specs,
            out_specs=out_spec,
        ),
        compiler_params=pltpu.CompilerParams(
            dimension_semantics=("parallel",),          # v7x: 1 batch per TC
            vmem_limit_bytes=32 * 1024 * 1024,          # explicit, ample headroom
        ),
    )(x, fp["wqkv"], fp["bqkv"], fp["wo"], fp["bo"],
      fp["ln1w"], fp["ln1b"], fp["w1"], fp["b1"], fp["w2t"], fp["b2"],
      fp["ln2w"], fp["ln2b"], fp["fc1wt"], fp["fc1bt"], noise)


# ----------------------------------------------------------------------------
# Pure-JAX reference (same params, same noise).  It mirrors the kernel's
# numerics policy -- matmul inputs rounded to bf16, f32 accumulation (the
# MXU-native path the perf review asked for) -- so the comparison stays tight;
# all non-matmul math (bias, layernorm, softmax, exp, tanh) is f32.
# ----------------------------------------------------------------------------
def reference_forward(x, layer_params, fc1_w, fc1_b, noise, head_num, num_path):
    f32, bf16 = jnp.float32, jnp.bfloat16

    def mm(a, b):
        return jnp.dot(a.astype(bf16), b.astype(bf16), preferred_element_type=f32)

    B, S, D = x.shape
    hd = D // head_num
    scale = 1.0 / math.sqrt(hd)
    h = x
    for p in layer_params:
        q = (mm(h, p["wq"]) + p["bq"]).reshape(B, S, head_num, hd).transpose(0, 2, 1, 3)
        k = (mm(h, p["wk"]) + p["bk"]).reshape(B, S, head_num, hd).transpose(0, 2, 1, 3)
        v = (mm(h, p["wv"]) + p["bv"]).reshape(B, S, head_num, hd).transpose(0, 2, 1, 3)
        s = jnp.einsum("bhqd,bhkd->bhqk", q.astype(bf16), k.astype(bf16),
                       preferred_element_type=f32) * scale
        s = s - jnp.max(s, axis=-1, keepdims=True)
        a = jnp.exp(s)
        a = a / jnp.sum(a, axis=-1, keepdims=True)
        o = jnp.einsum("bhqk,bhkd->bhqd", a.astype(bf16), v.astype(bf16),
                       preferred_element_type=f32)
        o = o.transpose(0, 2, 1, 3).reshape(B, S, D)
        o = mm(o, p["wo"]) + p["bo"]
        x1 = _layer_norm(h + o, p["ln1_w"], p["ln1_b"])
        f = jnp.maximum(mm(x1, p["w1"]) + p["b1"], 0.0)
        h = _layer_norm(x1 + mm(f, p["w2"]) + p["b2"], p["ln2_w"], p["ln2_b"])

    y = mm(h[:, :num_path, :], fc1_w) + fc1_b            # (B, P, 2)
    yT = jnp.transpose(y, (0, 2, 1))                      # (B, 2, P)
    mean = yT[:, 0:1, :]
    std = jnp.exp(yT[:, 1:2, :])
    action = jnp.tanh(mean + std * noise)                 # noise (B, 1, P)
    return jnp.concatenate([mean, std, action], axis=1)   # (B, 3, P)


# ----------------------------------------------------------------------------
# Deterministic parameter initialization (shapes from the module __init__;
# weights stored in math layout so y = x @ W; wrapper re-layouts for the kernel).
# ----------------------------------------------------------------------------
def init_params(key, d_model, head_num, layer_num, dim_ff):
    s = 0.05
    layers = []
    for li in range(layer_num):
        ks = jax.random.split(jax.random.fold_in(key, li), 8)
        layers.append(dict(
            wq=jax.random.normal(ks[0], (d_model, d_model), jnp.float32) * s,
            wk=jax.random.normal(ks[1], (d_model, d_model), jnp.float32) * s,
            wv=jax.random.normal(ks[2], (d_model, d_model), jnp.float32) * s,
            bq=jax.random.normal(ks[3], (1, d_model), jnp.float32) * s,
            bk=jax.random.normal(ks[4], (1, d_model), jnp.float32) * s,
            bv=jax.random.normal(ks[5], (1, d_model), jnp.float32) * s,
            wo=jax.random.normal(ks[6], (d_model, d_model), jnp.float32) * s,
            bo=jnp.zeros((1, d_model), jnp.float32),
            ln1_w=jnp.ones((1, d_model), jnp.float32),
            ln1_b=jnp.zeros((1, d_model), jnp.float32),
            w1=jax.random.normal(ks[7], (d_model, dim_ff), jnp.float32) * s,
            b1=jnp.zeros((1, dim_ff), jnp.float32),
            w2=jax.random.normal(jax.random.fold_in(ks[7], 1),
                                 (dim_ff, d_model), jnp.float32) * s,
            b2=jnp.zeros((1, d_model), jnp.float32),
            ln2_w=jnp.ones((1, d_model), jnp.float32),
            ln2_b=jnp.zeros((1, d_model), jnp.float32),
        ))
    kf = jax.random.fold_in(key, 1000)
    fc1_w = jax.random.normal(kf, (d_model, 2), jnp.float32) * s
    fc1_b = jax.random.normal(jax.random.fold_in(kf, 1), (1, 2), jnp.float32) * s
    return layers, fc1_w, fc1_b


if __name__ == "__main__":
    # config['balance_model_config'] = {feature_dim: 32, head_num: 4, layer_num: 2}
    # config['path_num'] = 4 ; nn.TransformerEncoderLayer default dim_feedforward = 2048
    batch, seq, d_model = 2, 8, 32
    head_num, layer_num, num_path, dim_ff = 4, 2, 4, 2048

    key = jax.random.PRNGKey(0)
    k_params, k_x, k_noise = jax.random.split(key, 3)

    layer_params, fc1_w, fc1_b = init_params(k_params, d_model, head_num,
                                             layer_num, dim_ff)
    x = jax.random.normal(k_x, (batch, seq, d_model), jnp.float32)
    # torch.randn_like(mean) where mean is (B, 1, P): generated host-side here.
    noise = jax.random.normal(k_noise, (batch, 1, num_path), jnp.float32)

    ans = transformer_policy_net_forward(x, layer_params, fc1_w, fc1_b, noise,
                                         head_num, num_path)
    ans = jax.block_until_ready(ans)

    ref = reference_forward(x, layer_params, fc1_w, fc1_b, noise,
                            head_num, num_path)
    assert ans.shape == (batch, 3, num_path), ans.shape
    np.testing.assert_allclose(np.asarray(ans), np.asarray(ref),
                               atol=2e-3, rtol=2e-3)
    print("KERNEL_OK")
</pallas_src>

<mosaic_0001>
module attributes {stable_mosaic.version = 11 : i64} {
  func.func @fused_policy_kernel(%arg0: i32, %arg1: memref<1x8x32xf32, #tpu.memory_space<vmem>>, %arg2: memref<2x32x96xbf16, #tpu.memory_space<vmem>>, %arg3: memref<2x1x96xf32, #tpu.memory_space<vmem>>, %arg4: memref<2x32x32xbf16, #tpu.memory_space<vmem>>, %arg5: memref<2x1x32xf32, #tpu.memory_space<vmem>>, %arg6: memref<2x1x32xf32, #tpu.memory_space<vmem>>, %arg7: memref<2x1x32xf32, #tpu.memory_space<vmem>>, %arg8: memref<2x32x2048xbf16, #tpu.memory_space<vmem>>, %arg9: memref<2x1x2048xf32, #tpu.memory_space<vmem>>, %arg10: memref<2x32x2048xbf16, #tpu.memory_space<vmem>>, %arg11: memref<2x1x32xf32, #tpu.memory_space<vmem>>, %arg12: memref<2x1x32xf32, #tpu.memory_space<vmem>>, %arg13: memref<2x1x32xf32, #tpu.memory_space<vmem>>, %arg14: memref<2x32xbf16, #tpu.memory_space<vmem>>, %arg15: memref<2x1xf32, #tpu.memory_space<vmem>>, %arg16: memref<1x1x4xf32, #tpu.memory_space<vmem>>, %arg17: memref<1x3x4xf32, #tpu.memory_space<vmem>>) attributes {dimension_semantics = [#tpu.dimension_semantics<parallel>], iteration_bounds = array<i64: 2>, scalar_prefetch = 0 : i64, scratch_operands = 0 : i64, tpu.core_type = #tpu.core_type<tc>, window_params = [{transform_indices = @transform_0, window_bounds = array<i64: 1, 8, 32>}, {pipeline_mode = #tpu.pipeline_mode<synchronous>, transform_indices = @transform_1, window_bounds = array<i64: 2, 32, 96>}, {pipeline_mode = #tpu.pipeline_mode<synchronous>, transform_indices = @transform_2, window_bounds = array<i64: 2, 1, 96>}, {pipeline_mode = #tpu.pipeline_mode<synchronous>, transform_indices = @transform_3, window_bounds = array<i64: 2, 32, 32>}, {pipeline_mode = #tpu.pipeline_mode<synchronous>, transform_indices = @transform_4, window_bounds = array<i64: 2, 1, 32>}, {pipeline_mode = #tpu.pipeline_mode<synchronous>, transform_indices = @transform_5, window_bounds = array<i64: 2, 1, 32>}, {pipeline_mode = #tpu.pipeline_mode<synchronous>, transform_indices = @transform_6, window_bounds = array<i64: 2, 1, 32>}, {pipeline_mode = #tpu.pipeline_mode<synchronous>, transform_indices = @transform_7, window_bounds = array<i64: 2, 32, 2048>}, {pipeline_mode = #tpu.pipeline_mode<synchronous>, transform_indices = @transform_8, window_bounds = array<i64: 2, 1, 2048>}, {pipeline_mode = #tpu.pipeline_mode<synchronous>, transform_indices = @transform_9, window_bounds = array<i64: 2, 32, 2048>}, {pipeline_mode = #tpu.pipeline_mode<synchronous>, transform_indices = @transform_10, window_bounds = array<i64: 2, 1, 32>}, {pipeline_mode = #tpu.pipeline_mode<synchronous>, transform_indices = @transform_11, window_bounds = array<i64: 2, 1, 32>}, {pipeline_mode = #tpu.pipeline_mode<synchronous>, transform_indices = @transform_12, window_bounds = array<i64: 2, 1, 32>}, {pipeline_mode = #tpu.pipeline_mode<synchronous>, transform_indices = @transform_13, window_bounds = array<i64: 2, 32>}, {pipeline_mode = #tpu.pipeline_mode<synchronous>, transform_indices = @transform_14, window_bounds = array<i64: 2, 1>}, {transform_indices = @transform_15, window_bounds = array<i64: 1, 1, 4>}, {transform_indices = @transform_16, window_bounds = array<i64: 1, 3, 4>}]} {
    %c0 = arith.constant 0 : index
    %c0_0 = arith.constant 0 : index
    %c0_1 = arith.constant 0 : index
    %0 = vector.load %arg1[%c0, %c0_0, %c0_1] : memref<1x8x32xf32, #tpu.memory_space<vmem>>, vector<1x8x32xf32>
    %1 = vector.shape_cast %0 : vector<1x8x32xf32> to vector<8x32xf32>
    %2 = arith.truncf %1 : vector<8x32xf32> to vector<8x32xbf16>
    %c0_2 = arith.constant 0 : index
    %c0_3 = arith.constant 0 : index
    %c0_4 = arith.constant 0 : index
    %3 = vector.load %arg2[%c0_2, %c0_3, %c0_4] : memref<2x32x96xbf16, #tpu.memory_space<vmem>>, vector<1x32x96xbf16>
    %4 = vector.shape_cast %3 : vector<1x32x96xbf16> to vector<32x96xbf16>
    %cst = arith.constant dense<0.000000e+00> : vector<8x96xf32>
    %5 = tpu.matmul %2, %4, %cst {dimension_numbers = #tpu.dot_dimension_numbers<[1], [0], [0], [1], [0, 0, 1, 1], [], []>} : vector<8x32xbf16>, vector<32x96xbf16>, vector<8x96xf32> -> vector<8x96xf32>
    %c0_5 = arith.constant 0 : index
    %c0_6 = arith.constant 0 : index
    %c0_7 = arith.constant 0 : index
    %6 = vector.load %arg3[%c0_5, %c0_6, %c0_7] : memref<2x1x96xf32, #tpu.memory_space<vmem>>, vector<1x1x96xf32>
    %7 = vector.shape_cast %6 : vector<1x1x96xf32> to vector<1x96xf32>
    %8 = vector.broadcast %7 : vector<1x96xf32> to vector<8x96xf32>
    %9 = arith.addf %5, %8 : vector<8x96xf32>
    %10 = vector.extract_strided_slice %9 {offsets = [0, 0], sizes = [8, 32], strides = [1, 1]} : vector<8x96xf32> to vector<8x32xf32>
    %11 = arith.truncf %10 : vector<8x32xf32> to vector<8x32xbf16>
    %12 = vector.extract_strided_slice %9 {offsets = [0, 32], sizes = [8, 32], strides = [1, 1]} : vector<8x96xf32> to vector<8x32xf32>
    %13 = arith.truncf %12 : vector<8x32xf32> to vector<8x32xbf16>
    %14 = vector.extract_strided_slice %9 {offsets = [0, 64], sizes = [8, 32], strides = [1, 1]} : vector<8x96xf32> to vector<8x32xf32>
    %15 = arith.truncf %14 : vector<8x32xf32> to vector<8x32xbf16>
    %16 = vector.extract_strided_slice %11 {offsets = [0, 0], sizes = [8, 8], strides = [1, 1]} : vector<8x32xbf16> to vector<8x8xbf16>
    %17 = vector.extract_strided_slice %13 {offsets = [0, 0], sizes = [8, 8], strides = [1, 1]} : vector<8x32xbf16> to vector<8x8xbf16>
    %cst_8 = arith.constant dense<0.000000e+00> : vector<8x8xf32>
    %18 = tpu.matmul %16, %17, %cst_8 {dimension_numbers = #tpu.dot_dimension_numbers<[1], [1], [0], [0], [0, 0, 1, 0], [], []>} : vector<8x8xbf16>, vector<8x8xbf16>, vector<8x8xf32> -> vector<8x8xf32>
    %19 = vector.extract_strided_slice %11 {offsets = [0, 8], sizes = [8, 8], strides = [1, 1]} : vector<8x32xbf16> to vector<8x8xbf16>
    %20 = vector.extract_strided_slice %13 {offsets = [0, 8], sizes = [8, 8], strides = [1, 1]} : vector<8x32xbf16> to vector<8x8xbf16>
    %cst_9 = arith.constant dense<0.000000e+00> : vector<8x8xf32>
    %21 = tpu.matmul %19, %20, %cst_9 {dimension_numbers = #tpu.dot_dimension_numbers<[1], [1], [0], [0], [0, 0, 1, 0], [], []>} : vector<8x8xbf16>, vector<8x8xbf16>, vector<8x8xf32> -> vector<8x8xf32>
    %22 = vector.extract_strided_slice %11 {offsets = [0, 16], sizes = [8, 8], strides = [1, 1]} : vector<8x32xbf16> to vector<8x8xbf16>
    %23 = vector.extract_strided_slice %13 {offsets = [0, 16], sizes = [8, 8], strides = [1, 1]} : vector<8x32xbf16> to vector<8x8xbf16>
    %cst_10 = arith.constant dense<0.000000e+00> : vector<8x8xf32>
    %24 = tpu.matmul %22, %23, %cst_10 {dimension_numbers = #tpu.dot_dimension_numbers<[1], [1], [0], [0], [0, 0, 1, 0], [], []>} : vector<8x8xbf16>, vector<8x8xbf16>, vector<8x8xf32> -> vector<8x8xf32>
    %25 = vector.extract_strided_slice %11 {offsets = [0, 24], sizes = [8, 8], strides = [1, 1]} : vector<8x32xbf16> to vector<8x8xbf16>
    %26 = vector.extract_strided_slice %13 {offsets = [0, 24], sizes = [8, 8], strides = [1, 1]} : vector<8x32xbf16> to vector<8x8xbf16>
    %cst_11 = arith.constant dense<0.000000e+00> : vector<8x8xf32>
    %27 = tpu.matmul %25, %26, %cst_11 {dimension_numbers = #tpu.dot_dimension_numbers<[1], [1], [0], [0], [0, 0, 1, 0], [], []>} : vector<8x8xbf16>, vector<8x8xbf16>, vector<8x8xf32> -> vector<8x8xf32>
    %28 = tpu.concatenate %18, %21, %24, %27 in 0 : vector<8x8xf32>, vector<8x8xf32>, vector<8x8xf32>, vector<8x8xf32> -> vector<32x8xf32>
    %cst_12 = arith.constant 0.353553385 : f32
    %29 = vector.broadcast %cst_12 : f32 to vector<32x8xf32>
    %30 = arith.mulf %28, %29 : vector<32x8xf32>
    %cst_13 = arith.constant dense<0xFF800000> : vector<32xf32>
    %31 = vector.multi_reduction <maximumf>, %30, %cst_13 [1] : vector<32x8xf32> to vector<32xf32>
    %32 = vector.shape_cast %31 : vector<32xf32> to vector<32x1xf32>
    %33 = vector.broadcast %32 : vector<32x1xf32> to vector<32x8xf32>
    %34 = arith.subf %30, %33 : vector<32x8xf32>
    %35 = math.exp %34 : vector<32x8xf32>
    %cst_14 = arith.constant dense<0.000000e+00> : vector<32xf32>
    %36 = vector.multi_reduction <add>, %35, %cst_14 [1] : vector<32x8xf32> to vector<32xf32>
    %37 = vector.shape_cast %36 : vector<32xf32> to vector<32x1xf32>
    %38 = vector.broadcast %37 : vector<32x1xf32> to vector<32x8xf32>
    %39 = arith.divf %35, %38 : vector<32x8xf32>
    %40 = arith.truncf %39 : vector<32x8xf32> to vector<32x8xbf16>
    %41 = vector.extract_strided_slice %40 {offsets = [0, 0], sizes = [8, 8], strides = [1, 1]} : vector<32x8xbf16> to vector<8x8xbf16>
    %42 = vector.extract_strided_slice %15 {offsets = [0, 0], sizes = [8, 8], strides = [1, 1]} : vector<8x32xbf16> to vector<8x8xbf16>
    %cst_15 = arith.constant dense<0.000000e+00> : vector<8x8xf32>
    %43 = tpu.matmul %41, %42, %cst_15 {dimension_numbers = #tpu.dot_dimension_numbers<[1], [0], [0], [1], [0, 0, 1, 1], [], []>} : vector<8x8xbf16>, vector<8x8xbf16>, vector<8x8xf32> -> vector<8x8xf32>
    %44 = vector.extract_strided_slice %40 {offsets = [8, 0], sizes = [8, 8], strides = [1, 1]} : vector<32x8xbf16> to vector<8x8xbf16>
    %45 = vector.extract_strided_slice %15 {offsets = [0, 8], sizes = [8, 8], strides = [1, 1]} : vector<8x32xbf16> to vector<8x8xbf16>
    %cst_16 = arith.constant dense<0.000000e+00> : vector<8x8xf32>
    %46 = tpu.matmul %44, %45, %cst_16 {dimension_numbers = #tpu.dot_dimension_numbers<[1], [0], [0], [1], [0, 0, 1, 1], [], []>} : vector<8x8xbf16>, vector<8x8xbf16>, vector<8x8xf32> -> vector<8x8xf32>
    %47 = vector.extract_strided_slice %40 {offsets = [16, 0], sizes = [8, 8], strides = [1, 1]} : vector<32x8xbf16> to vector<8x8xbf16>
    %48 = vector.extract_strided_slice %15 {offsets = [0, 16], sizes = [8, 8], strides = [1, 1]} : vector<8x32xbf16> to vector<8x8xbf16>
    %cst_17 = arith.constant dense<0.000000e+00> : vector<8x8xf32>
    %49 = tpu.matmul %47, %48, %cst_17 {dimension_numbers = #tpu.dot_dimension_numbers<[1], [0], [0], [1], [0, 0, 1, 1], [], []>} : vector<8x8xbf16>, vector<8x8xbf16>, vector<8x8xf32> -> vector<8x8xf32>
    %50 = vector.extract_strided_slice %40 {offsets = [24, 0], sizes = [8, 8], strides = [1, 1]} : vector<32x8xbf16> to vector<8x8xbf16>
    %51 = vector.extract_strided_slice %15 {offsets = [0, 24], sizes = [8, 8], strides = [1, 1]} : vector<8x32xbf16> to vector<8x8xbf16>
    %cst_18 = arith.constant dense<0.000000e+00> : vector<8x8xf32>
    %52 = tpu.matmul %50, %51, %cst_18 {dimension_numbers = #tpu.dot_dimension_numbers<[1], [0], [0], [1], [0, 0, 1, 1], [], []>} : vector<8x8xbf16>, vector<8x8xbf16>, vector<8x8xf32> -> vector<8x8xf32>
    %53 = tpu.concatenate %43, %46, %49, %52 in 1 : vector<8x8xf32>, vector<8x8xf32>, vector<8x8xf32>, vector<8x8xf32> -> vector<8x32xf32>
    %54 = arith.truncf %53 : vector<8x32xf32> to vector<8x32xbf16>
    %c0_19 = arith.constant 0 : index
    %c0_20 = arith.constant 0 : index
    %c0_21 = arith.constant 0 : index
    %55 = vector.load %arg4[%c0_19, %c0_20, %c0_21] : memref<2x32x32xbf16, #tpu.memory_space<vmem>>, vector<1x32x32xbf16>
    %56 = vector.shape_cast %55 : vector<1x32x32xbf16> to vector<32x32xbf16>
    %cst_22 = arith.constant dense<0.000000e+00> : vector<8x32xf32>
    %57 = tpu.matmul %54, %56, %cst_22 {dimension_numbers = #tpu.dot_dimension_numbers<[1], [0], [0], [1], [0, 0, 1, 1], [], []>} : vector<8x32xbf16>, vector<32x32xbf16>, vector<8x32xf32> -> vector<8x32xf32>
    %c0_23 = arith.constant 0 : index
    %c0_24 = arith.constant 0 : index
    %c0_25 = arith.constant 0 : index
    %58 = vector.load %arg5[%c0_23, %c0_24, %c0_25] : memref<2x1x32xf32, #tpu.memory_space<vmem>>, vector<1x1x32xf32>
    %59 = vector.shape_cast %58 : vector<1x1x32xf32> to vector<1x32xf32>
    %60 = vector.broadcast %59 : vector<1x32xf32> to vector<8x32xf32>
    %61 = arith.addf %57, %60 : vector<8x32xf32>
    %62 = arith.addf %1, %61 : vector<8x32xf32>
    %c0_26 = arith.constant 0 : index
    %c0_27 = arith.constant 0 : index
    %c0_28 = arith.constant 0 : index
    %63 = vector.load %arg6[%c0_26, %c0_27, %c0_28] : memref<2x1x32xf32, #tpu.memory_space<vmem>>, vector<1x1x32xf32>
    %64 = vector.shape_cast %63 : vector<1x1x32xf32> to vector<1x32xf32>
    %c0_29 = arith.constant 0 : index
    %c0_30 = arith.constant 0 : index
    %c0_31 = arith.constant 0 : index
    %65 = vector.load %arg7[%c0_29, %c0_30, %c0_31] : memref<2x1x32xf32, #tpu.memory_space<vmem>>, vector<1x1x32xf32>
    %66 = vector.shape_cast %65 : vector<1x1x32xf32> to vector<1x32xf32>
    %cst_32 = arith.constant dense<0.000000e+00> : vector<8xf32>
    %67 = vector.multi_reduction <add>, %62, %cst_32 [1] : vector<8x32xf32> to vector<8xf32>
    %68 = vector.shape_cast %67 : vector<8xf32> to vector<8x1xf32>
    %cst_33 = arith.constant 3.200000e+01 : f32
    %69 = vector.broadcast %cst_33 : f32 to vector<8x1xf32>
    %70 = arith.divf %68, %69 : vector<8x1xf32>
    %71 = vector.broadcast %70 : vector<8x1xf32> to vector<8x32xf32>
    %72 = arith.subf %62, %71 : vector<8x32xf32>
    %73 = arith.mulf %72, %72 : vector<8x32xf32>
    %cst_34 = arith.constant dense<0.000000e+00> : vector<8xf32>
    %74 = vector.multi_reduction <add>, %73, %cst_34 [1] : vector<8x32xf32> to vector<8xf32>
    %75 = vector.shape_cast %74 : vector<8xf32> to vector<8x1xf32>
    %cst_35 = arith.constant 3.200000e+01 : f32
    %76 = vector.broadcast %cst_35 : f32 to vector<8x1xf32>
    %77 = arith.divf %75, %76 : vector<8x1xf32>
    %78 = vector.broadcast %70 : vector<8x1xf32> to vector<8x32xf32>
    %79 = arith.subf %62, %78 : vector<8x32xf32>
    %cst_36 = arith.constant 9.99999974E-6 : f32
    %80 = vector.broadcast %cst_36 : f32 to vector<8x1xf32>
    %81 = arith.addf %77, %80 : vector<8x1xf32>
    %82 = math.rsqrt %81 : vector<8x1xf32>
    %83 = vector.broadcast %82 : vector<8x1xf32> to vector<8x32xf32>
    %84 = arith.mulf %79, %83 : vector<8x32xf32>
    %85 = vector.broadcast %64 : vector<1x32xf32> to vector<8x32xf32>
    %86 = arith.mulf %84, %85 : vector<8x32xf32>
    %87 = vector.broadcast %66 : vector<1x32xf32> to vector<8x32xf32>
    %88 = arith.addf %86, %87 : vector<8x32xf32>
    %89 = arith.truncf %88 : vector<8x32xf32> to vector<8x32xbf16>
    %c0_37 = arith.constant 0 : index
    %c0_38 = arith.constant 0 : index
    %c0_39 = arith.constant 0 : index
    %90 = vector.load %arg8[%c0_37, %c0_38, %c0_39] : memref<2x32x2048xbf16, #tpu.memory_space<vmem>>, vector<1x32x2048xbf16>
    %91 = vector.shape_cast %90 : vector<1x32x2048xbf16> to vector<32x2048xbf16>
    %cst_40 = arith.constant dense<0.000000e+00> : vector<8x2048xf32>
    %92 = tpu.matmul %89, %91, %cst_40 {dimension_numbers = #tpu.dot_dimension_numbers<[1], [0], [0], [1], [0, 0, 1, 1], [], []>} : vector<8x32xbf16>, vector<32x2048xbf16>, vector<8x2048xf32> -> vector<8x2048xf32>
    %c0_41 = arith.constant 0 : index
    %c0_42 = arith.constant 0 : index
    %c0_43 = arith.constant 0 : index
    %93 = vector.load %arg9[%c0_41, %c0_42, %c0_43] : memref<2x1x2048xf32, #tpu.memory_space<vmem>>, vector<1x1x2048xf32>
    %94 = vector.shape_cast %93 : vector<1x1x2048xf32> to vector<1x2048xf32>
    %95 = vector.broadcast %94 : vector<1x2048xf32> to vector<8x2048xf32>
    %96 = arith.addf %92, %95 : vector<8x2048xf32>
    %cst_44 = arith.constant 0.000000e+00 : f32
    %97 = vector.broadcast %cst_44 : f32 to vector<8x2048xf32>
    %98 = arith.maximumf %96, %97 : vector<8x2048xf32>
    %99 = arith.truncf %98 : vector<8x2048xf32> to vector<8x2048xbf16>
    %c0_45 = arith.constant 0 : index
    %c0_46 = arith.constant 0 : index
    %c0_47 = arith.constant 0 : index
    %100 = vector.load %arg10[%c0_45, %c0_46, %c0_47] : memref<2x32x2048xbf16, #tpu.memory_space<vmem>>, vector<1x32x2048xbf16>
    %101 = vector.shape_cast %100 : vector<1x32x2048xbf16> to vector<32x2048xbf16>
    %cst_48 = arith.constant dense<0.000000e+00> : vector<8x32xf32>
    %102 = tpu.matmul %99, %101, %cst_48 {dimension_numbers = #tpu.dot_dimension_numbers<[1], [1], [0], [0], [0, 0, 1, 0], [], []>} : vector<8x2048xbf16>, vector<32x2048xbf16>, vector<8x32xf32> -> vector<8x32xf32>
    %c0_49 = arith.constant 0 : index
    %c0_50 = arith.constant 0 : index
    %c0_51 = arith.constant 0 : index
    %103 = vector.load %arg11[%c0_49, %c0_50, %c0_51] : memref<2x1x32xf32, #tpu.memory_space<vmem>>, vector<1x1x32xf32>
    %104 = vector.shape_cast %103 : vector<1x1x32xf32> to vector<1x32xf32>
    %105 = vector.broadcast %104 : vector<1x32xf32> to vector<8x32xf32>
    %106 = arith.addf %102, %105 : vector<8x32xf32>
    %107 = arith.addf %88, %106 : vector<8x32xf32>
    %c0_52 = arith.constant 0 : index
    %c0_53 = arith.constant 0 : index
    %c0_54 = arith.constant 0 : index
    %108 = vector.load %arg12[%c0_52, %c0_53, %c0_54] : memref<2x1x32xf32, #tpu.memory_space<vmem>>, vector<1x1x32xf32>
    %109 = vector.shape_cast %108 : vector<1x1x32xf32> to vector<1x32xf32>
    %c0_55 = arith.constant 0 : index
    %c0_56 = arith.constant 0 : index
    %c0_57 = arith.constant 0 : index
    %110 = vector.load %arg13[%c0_55, %c0_56, %c0_57] : memref<2x1x32xf32, #tpu.memory_space<vmem>>, vector<1x1x32xf32>
    %111 = vector.shape_cast %110 : vector<1x1x32xf32> to vector<1x32xf32>
    %cst_58 = arith.constant dense<0.000000e+00> : vector<8xf32>
    %112 = vector.multi_reduction <add>, %107, %cst_58 [1] : vector<8x32xf32> to vector<8xf32>
    %113 = vector.shape_cast %112 : vector<8xf32> to vector<8x1xf32>
    %cst_59 = arith.constant 3.200000e+01 : f32
    %114 = vector.broadcast %cst_59 : f32 to vector<8x1xf32>
    %115 = arith.divf %113, %114 : vector<8x1xf32>
    %116 = vector.broadcast %115 : vector<8x1xf32> to vector<8x32xf32>
    %117 = arith.subf %107, %116 : vector<8x32xf32>
    %118 = arith.mulf %117, %117 : vector<8x32xf32>
    %cst_60 = arith.constant dense<0.000000e+00> : vector<8xf32>
    %119 = vector.multi_reduction <add>, %118, %cst_60 [1] : vector<8x32xf32> to vector<8xf32>
    %120 = vector.shape_cast %119 : vector<8xf32> to vector<8x1xf32>
    %cst_61 = arith.constant 3.200000e+01 : f32
    %121 = vector.broadcast %cst_61 : f32 to vector<8x1xf32>
    %122 = arith.divf %120, %121 : vector<8x1xf32>
    %123 = vector.broadcast %115 : vector<8x1xf32> to vector<8x32xf32>
    %124 = arith.subf %107, %123 : vector<8x32xf32>
    %cst_62 = arith.constant 9.99999974E-6 : f32
    %125 = vector.broadcast %cst_62 : f32 to vector<8x1xf32>
    %126 = arith.addf %122, %125 : vector<8x1xf32>
    %127 = math.rsqrt %126 : vector<8x1xf32>
    %128 = vector.broadcast %127 : vector<8x1xf32> to vector<8x32xf32>
    %129 = arith.mulf %124, %128 : vector<8x32xf32>
    %130 = vector.broadcast %109 : vector<1x32xf32> to vector<8x32xf32>
    %131 = arith.mulf %129, %130 : vector<8x32xf32>
    %132 = vector.broadcast %111 : vector<1x32xf32> to vector<8x32xf32>
    %133 = arith.addf %131, %132 : vector<8x32xf32>
    %134 = arith.truncf %133 : vector<8x32xf32> to vector<8x32xbf16>
    %c1 = arith.constant 1 : index
    %c0_63 = arith.constant 0 : index
    %c0_64 = arith.constant 0 : index
    %135 = vector.load %arg2[%c1, %c0_63, %c0_64] : memref<2x32x96xbf16, #tpu.memory_space<vmem>>, vector<1x32x96xbf16>
    %136 = vector.shape_cast %135 : vector<1x32x96xbf16> to vector<32x96xbf16>
    %cst_65 = arith.constant dense<0.000000e+00> : vector<8x96xf32>
    %137 = tpu.matmul %134, %136, %cst_65 {dimension_numbers = #tpu.dot_dimension_numbers<[1], [0], [0], [1], [0, 0, 1, 1], [], []>} : vector<8x32xbf16>, vector<32x96xbf16>, vector<8x96xf32> -> vector<8x96xf32>
    %c1_66 = arith.constant 1 : index
    %c0_67 = arith.constant 0 : index
    %c0_68 = arith.constant 0 : index
    %138 = vector.load %arg3[%c1_66, %c0_67, %c0_68] : memref<2x1x96xf32, #tpu.memory_space<vmem>>, vector<1x1x96xf32>
    %139 = vector.shape_cast %138 : vector<1x1x96xf32> to vector<1x96xf32>
    %140 = vector.broadcast %139 : vector<1x96xf32> to vector<8x96xf32>
    %141 = arith.addf %137, %140 : vector<8x96xf32>
    %142 = vector.extract_strided_slice %141 {offsets = [0, 0], sizes = [8, 32], strides = [1, 1]} : vector<8x96xf32> to vector<8x32xf32>
    %143 = arith.truncf %142 : vector<8x32xf32> to vector<8x32xbf16>
    %144 = vector.extract_strided_slice %141 {offsets = [0, 32], sizes = [8, 32], strides = [1, 1]} : vector<8x96xf32> to vector<8x32xf32>
    %145 = arith.truncf %144 : vector<8x32xf32> to vector<8x32xbf16>
    %146 = vector.extract_strided_slice %141 {offsets = [0, 64], sizes = [8, 32], strides = [1, 1]} : vector<8x96xf32> to vector<8x32xf32>
    %147 = arith.truncf %146 : vector<8x32xf32> to vector<8x32xbf16>
    %148 = vector.extract_strided_slice %143 {offsets = [0, 0], sizes = [8, 8], strides = [1, 1]} : vector<8x32xbf16> to vector<8x8xbf16>
    %149 = vector.extract_strided_slice %145 {offsets = [0, 0], sizes = [8, 8], strides = [1, 1]} : vector<8x32xbf16> to vector<8x8xbf16>
    %cst_69 = arith.constant dense<0.000000e+00> : vector<8x8xf32>
    %150 = tpu.matmul %148, %149, %cst_69 {dimension_numbers = #tpu.dot_dimension_numbers<[1], [1], [0], [0], [0, 0, 1, 0], [], []>} : vector<8x8xbf16>, vector<8x8xbf16>, vector<8x8xf32> -> vector<8x8xf32>
    %151 = vector.extract_strided_slice %143 {offsets = [0, 8], sizes = [8, 8], strides = [1, 1]} : vector<8x32xbf16> to vector<8x8xbf16>
    %152 = vector.extract_strided_slice %145 {offsets = [0, 8], sizes = [8, 8], strides = [1, 1]} : vector<8x32xbf16> to vector<8x8xbf16>
    %cst_70 = arith.constant dense<0.000000e+00> : vector<8x8xf32>
    %153 = tpu.matmul %151, %152, %cst_70 {dimension_numbers = #tpu.dot_dimension_numbers<[1], [1], [0], [0], [0, 0, 1, 0], [], []>} : vector<8x8xbf16>, vector<8x8xbf16>, vector<8x8xf32> -> vector<8x8xf32>
    %154 = vector.extract_strided_slice %143 {offsets = [0, 16], sizes = [8, 8], strides = [1, 1]} : vector<8x32xbf16> to vector<8x8xbf16>
    %155 = vector.extract_strided_slice %145 {offsets = [0, 16], sizes = [8, 8], strides = [1, 1]} : vector<8x32xbf16> to vector<8x8xbf16>
    %cst_71 = arith.constant dense<0.000000e+00> : vector<8x8xf32>
    %156 = tpu.matmul %154, %155, %cst_71 {dimension_numbers = #tpu.dot_dimension_numbers<[1], [1], [0], [0], [0, 0, 1, 0], [], []>} : vector<8x8xbf16>, vector<8x8xbf16>, vector<8x8xf32> -> vector<8x8xf32>
    %157 = vector.extract_strided_slice %143 {offsets = [0, 24], sizes = [8, 8], strides = [1, 1]} : vector<8x32xbf16> to vector<8x8xbf16>
    %158 = vector.extract_strided_slice %145 {offsets = [0, 24], sizes = [8, 8], strides = [1, 1]} : vector<8x32xbf16> to vector<8x8xbf16>
    %cst_72 = arith.constant dense<0.000000e+00> : vector<8x8xf32>
    %159 = tpu.matmul %157, %158, %cst_72 {dimension_numbers = #tpu.dot_dimension_numbers<[1], [1], [0], [0], [0, 0, 1, 0], [], []>} : vector<8x8xbf16>, vector<8x8xbf16>, vector<8x8xf32> -> vector<8x8xf32>
    %160 = tpu.concatenate %150, %153, %156, %159 in 0 : vector<8x8xf32>, vector<8x8xf32>, vector<8x8xf32>, vector<8x8xf32> -> vector<32x8xf32>
    %cst_73 = arith.constant 0.353553385 : f32
    %161 = vector.broadcast %cst_73 : f32 to vector<32x8xf32>
    %162 = arith.mulf %160, %161 : vector<32x8xf32>
    %cst_74 = arith.constant dense<0xFF800000> : vector<32xf32>
    %163 = vector.multi_reduction <maximumf>, %162, %cst_74 [1] : vector<32x8xf32> to vector<32xf32>
    %164 = vector.shape_cast %163 : vector<32xf32> to vector<32x1xf32>
    %165 = vector.broadcast %164 : vector<32x1xf32> to vector<32x8xf32>
    %166 = arith.subf %162, %165 : vector<32x8xf32>
    %167 = math.exp %166 : vector<32x8xf32>
    %cst_75 = arith.constant dense<0.000000e+00> : vector<32xf32>
    %168 = vector.multi_reduction <add>, %167, %cst_75 [1] : vector<32x8xf32> to vector<32xf32>
    %169 = vector.shape_cast %168 : vector<32xf32> to vector<32x1xf32>
    %170 = vector.broadcast %169 : vector<32x1xf32> to vector<32x8xf32>
    %171 = arith.divf %167, %170 : vector<32x8xf32>
    %172 = arith.truncf %171 : vector<32x8xf32> to vector<32x8xbf16>
    %173 = vector.extract_strided_slice %172 {offsets = [0, 0], sizes = [8, 8], strides = [1, 1]} : vector<32x8xbf16> to vector<8x8xbf16>
    %174 = vector.extract_strided_slice %147 {offsets = [0, 0], sizes = [8, 8], strides = [1, 1]} : vector<8x32xbf16> to vector<8x8xbf16>
    %cst_76 = arith.constant dense<0.000000e+00> : vector<8x8xf32>
    %175 = tpu.matmul %173, %174, %cst_76 {dimension_numbers = #tpu.dot_dimension_numbers<[1], [0], [0], [1], [0, 0, 1, 1], [], []>} : vector<8x8xbf16>, vector<8x8xbf16>, vector<8x8xf32> -> vector<8x8xf32>
    %176 = vector.extract_strided_slice %172 {offsets = [8, 0], sizes = [8, 8], strides = [1, 1]} : vector<32x8xbf16> to vector<8x8xbf16>
    %177 = vector.extract_strided_slice %147 {offsets = [0, 8], sizes = [8, 8], strides = [1, 1]} : vector<8x32xbf16> to vector<8x8xbf16>
    %cst_77 = arith.constant dense<0.000000e+00> : vector<8x8xf32>
    %178 = tpu.matmul %176, %177, %cst_77 {dimension_numbers = #tpu.dot_dimension_numbers<[1], [0], [0], [1], [0, 0, 1, 1], [], []>} : vector<8x8xbf16>, vector<8x8xbf16>, vector<8x8xf32> -> vector<8x8xf32>
    %179 = vector.extract_strided_slice %172 {offsets = [16, 0], sizes = [8, 8], strides = [1, 1]} : vector<32x8xbf16> to vector<8x8xbf16>
    %180 = vector.extract_strided_slice %147 {offsets = [0, 16], sizes = [8, 8], strides = [1, 1]} : vector<8x32xbf16> to vector<8x8xbf16>
    %cst_78 = arith.constant dense<0.000000e+00> : vector<8x8xf32>
    %181 = tpu.matmul %179, %180, %cst_78 {dimension_numbers = #tpu.dot_dimension_numbers<[1], [0], [0], [1], [0, 0, 1, 1], [], []>} : vector<8x8xbf16>, vector<8x8xbf16>, vector<8x8xf32> -> vector<8x8xf32>
    %182 = vector.extract_strided_slice %172 {offsets = [24, 0], sizes = [8, 8], strides = [1, 1]} : vector<32x8xbf16> to vector<8x8xbf16>
    %183 = vector.extract_strided_slice %147 {offsets = [0, 24], sizes = [8, 8], strides = [1, 1]} : vector<8x32xbf16> to vector<8x8xbf16>
    %cst_79 = arith.constant dense<0.000000e+00> : vector<8x8xf32>
    %184 = tpu.matmul %182, %183, %cst_79 {dimension_numbers = #tpu.dot_dimension_numbers<[1], [0], [0], [1], [0, 0, 1, 1], [], []>} : vector<8x8xbf16>, vector<8x8xbf16>, vector<8x8xf32> -> vector<8x8xf32>
    %185 = tpu.concatenate %175, %178, %181, %184 in 1 : vector<8x8xf32>, vector<8x8xf32>, vector<8x8xf32>, vector<8x8xf32> -> vector<8x32xf32>
    %186 = arith.truncf %185 : vector<8x32xf32> to vector<8x32xbf16>
    %c1_80 = arith.constant 1 : index
    %c0_81 = arith.constant 0 : index
    %c0_82 = arith.constant 0 : index
    %187 = vector.load %arg4[%c1_80, %c0_81, %c0_82] : memref<2x32x32xbf16, #tpu.memory_space<vmem>>, vector<1x32x32xbf16>
    %188 = vector.shape_cast %187 : vector<1x32x32xbf16> to vector<32x32xbf16>
    %cst_83 = arith.constant dense<0.000000e+00> : vector<8x32xf32>
    %189 = tpu.matmul %186, %188, %cst_83 {dimension_numbers = #tpu.dot_dimension_numbers<[1], [0], [0], [1], [0, 0, 1, 1], [], []>} : vector<8x32xbf16>, vector<32x32xbf16>, vector<8x32xf32> -> vector<8x32xf32>
    %c1_84 = arith.constant 1 : index
    %c0_85 = arith.constant 0 : index
    %c0_86 = arith.constant 0 : index
    %190 = vector.load %arg5[%c1_84, %c0_85, %c0_86] : memref<2x1x32xf32, #tpu.memory_space<vmem>>, vector<1x1x32xf32>
    %191 = vector.shape_cast %190 : vector<1x1x32xf32> to vector<1x32xf32>
    %192 = vector.broadcast %191 : vector<1x32xf32> to vector<8x32xf32>
    %193 = arith.addf %189, %192 : vector<8x32xf32>
    %194 = arith.addf %133, %193 : vector<8x32xf32>
    %c1_87 = arith.constant 1 : index
    %c0_88 = arith.constant 0 : index
    %c0_89 = arith.constant 0 : index
    %195 = vector.load %arg6[%c1_87, %c0_88, %c0_89] : memref<2x1x32xf32, #tpu.memory_space<vmem>>, vector<1x1x32xf32>
    %196 = vector.shape_cast %195 : vector<1x1x32xf32> to vector<1x32xf32>
    %c1_90 = arith.constant 1 : index
    %c0_91 = arith.constant 0 : index
    %c0_92 = arith.constant 0 : index
    %197 = vector.load %arg7[%c1_90, %c0_91, %c0_92] : memref<2x1x32xf32, #tpu.memory_space<vmem>>, vector<1x1x32xf32>
    %198 = vector.shape_cast %197 : vector<1x1x32xf32> to vector<1x32xf32>
    %cst_93 = arith.constant dense<0.000000e+00> : vector<8xf32>
    %199 = vector.multi_reduction <add>, %194, %cst_93 [1] : vector<8x32xf32> to vector<8xf32>
    %200 = vector.shape_cast %199 : vector<8xf32> to vector<8x1xf32>
    %cst_94 = arith.constant 3.200000e+01 : f32
    %201 = vector.broadcast %cst_94 : f32 to vector<8x1xf32>
    %202 = arith.divf %200, %201 : vector<8x1xf32>
    %203 = vector.broadcast %202 : vector<8x1xf32> to vector<8x32xf32>
    %204 = arith.subf %194, %203 : vector<8x32xf32>
    %205 = arith.mulf %204, %204 : vector<8x32xf32>
    %cst_95 = arith.constant dense<0.000000e+00> : vector<8xf32>
    %206 = vector.multi_reduction <add>, %205, %cst_95 [1] : vector<8x32xf32> to vector<8xf32>
    %207 = vector.shape_cast %206 : vector<8xf32> to vector<8x1xf32>
    %cst_96 = arith.constant 3.200000e+01 : f32
    %208 = vector.broadcast %cst_96 : f32 to vector<8x1xf32>
    %209 = arith.divf %207, %208 : vector<8x1xf32>
    %210 = vector.broadcast %202 : vector<8x1xf32> to vector<8x32xf32>
    %211 = arith.subf %194, %210 : vector<8x32xf32>
    %cst_97 = arith.constant 9.99999974E-6 : f32
    %212 = vector.broadcast %cst_97 : f32 to vector<8x1xf32>
    %213 = arith.addf %209, %212 : vector<8x1xf32>
    %214 = math.rsqrt %213 : vector<8x1xf32>
    %215 = vector.broadcast %214 : vector<8x1xf32> to vector<8x32xf32>
    %216 = arith.mulf %211, %215 : vector<8x32xf32>
    %217 = vector.broadcast %196 : vector<1x32xf32> to vector<8x32xf32>
    %218 = arith.mulf %216, %217 : vector<8x32xf32>
    %219 = vector.broadcast %198 : vector<1x32xf32> to vector<8x32xf32>
    %220 = arith.addf %218, %219 : vector<8x32xf32>
    %221 = arith.truncf %220 : vector<8x32xf32> to vector<8x32xbf16>
    %c1_98 = arith.constant 1 : index
    %c0_99 = arith.constant 0 : index
    %c0_100 = arith.constant 0 : index
    %222 = vector.load %arg8[%c1_98, %c0_99, %c0_100] : memref<2x32x2048xbf16, #tpu.memory_space<vmem>>, vector<1x32x2048xbf16>
    %223 = vector.shape_cast %222 : vector<1x32x2048xbf16> to vector<32x2048xbf16>
    %cst_101 = arith.constant dense<0.000000e+00> : vector<8x2048xf32>
    %224 = tpu.matmul %221, %223, %cst_101 {dimension_numbers = #tpu.dot_dimension_numbers<[1], [0], [0], [1], [0, 0, 1, 1], [], []>} : vector<8x32xbf16>, vector<32x2048xbf16>, vector<8x2048xf32> -> vector<8x2048xf32>
    %c1_102 = arith.constant 1 : index
    %c0_103 = arith.constant 0 : index
    %c0_104 = arith.constant 0 : index
    %225 = vector.load %arg9[%c1_102, %c0_103, %c0_104] : memref<2x1x2048xf32, #tpu.memory_space<vmem>>, vector<1x1x2048xf32>
    %226 = vector.shape_cast %225 : vector<1x1x2048xf32> to vector<1x2048xf32>
    %227 = vector.broadcast %226 : vector<1x2048xf32> to vector<8x2048xf32>
    %228 = arith.addf %224, %227 : vector<8x2048xf32>
    %cst_105 = arith.constant 0.000000e+00 : f32
    %229 = vector.broadcast %cst_105 : f32 to vector<8x2048xf32>
    %230 = arith.maximumf %228, %229 : vector<8x2048xf32>
    %231 = arith.truncf %230 : vector<8x2048xf32> to vector<8x2048xbf16>
    %c1_106 = arith.constant 1 : index
    %c0_107 = arith.constant 0 : index
    %c0_108 = arith.constant 0 : index
    %232 = vector.load %arg10[%c1_106, %c0_107, %c0_108] : memref<2x32x2048xbf16, #tpu.memory_space<vmem>>, vector<1x32x2048xbf16>
    %233 = vector.shape_cast %232 : vector<1x32x2048xbf16> to vector<32x2048xbf16>
    %cst_109 = arith.constant dense<0.000000e+00> : vector<8x32xf32>
    %234 = tpu.matmul %231, %233, %cst_109 {dimension_numbers = #tpu.dot_dimension_numbers<[1], [1], [0], [0], [0, 0, 1, 0], [], []>} : vector<8x2048xbf16>, vector<32x2048xbf16>, vector<8x32xf32> -> vector<8x32xf32>
    %c1_110 = arith.constant 1 : index
    %c0_111 = arith.constant 0 : index
    %c0_112 = arith.constant 0 : index
    %235 = vector.load %arg11[%c1_110, %c0_111, %c0_112] : memref<2x1x32xf32, #tpu.memory_space<vmem>>, vector<1x1x32xf32>
    %236 = vector.shape_cast %235 : vector<1x1x32xf32> to vector<1x32xf32>
    %237 = vector.broadcast %236 : vector<1x32xf32> to vector<8x32xf32>
    %238 = arith.addf %234, %237 : vector<8x32xf32>
    %239 = arith.addf %220, %238 : vector<8x32xf32>
    %c1_113 = arith.constant 1 : index
    %c0_114 = arith.constant 0 : index
    %c0_115 = arith.constant 0 : index
    %240 = vector.load %arg12[%c1_113, %c0_114, %c0_115] : memref<2x1x32xf32, #tpu.memory_space<vmem>>, vector<1x1x32xf32>
    %241 = vector.shape_cast %240 : vector<1x1x32xf32> to vector<1x32xf32>
    %c1_116 = arith.constant 1 : index
    %c0_117 = arith.constant 0 : index
    %c0_118 = arith.constant 0 : index
    %242 = vector.load %arg13[%c1_116, %c0_117, %c0_118] : memref<2x1x32xf32, #tpu.memory_space<vmem>>, vector<1x1x32xf32>
    %243 = vector.shape_cast %242 : vector<1x1x32xf32> to vector<1x32xf32>
    %cst_119 = arith.constant dense<0.000000e+00> : vector<8xf32>
    %244 = vector.multi_reduction <add>, %239, %cst_119 [1] : vector<8x32xf32> to vector<8xf32>
    %245 = vector.shape_cast %244 : vector<8xf32> to vector<8x1xf32>
    %cst_120 = arith.constant 3.200000e+01 : f32
    %246 = vector.broadcast %cst_120 : f32 to vector<8x1xf32>
    %247 = arith.divf %245, %246 : vector<8x1xf32>
    %248 = vector.broadcast %247 : vector<8x1xf32> to vector<8x32xf32>
    %249 = arith.subf %239, %248 : vector<8x32xf32>
    %250 = arith.mulf %249, %249 : vector<8x32xf32>
    %cst_121 = arith.constant dense<0.000000e+00> : vector<8xf32>
    %251 = vector.multi_reduction <add>, %250, %cst_121 [1] : vector<8x32xf32> to vector<8xf32>
    %252 = vector.shape_cast %251 : vector<8xf32> to vector<8x1xf32>
    %cst_122 = arith.constant 3.200000e+01 : f32
    %253 = vector.broadcast %cst_122 : f32 to vector<8x1xf32>
    %254 = arith.divf %252, %253 : vector<8x1xf32>
    %255 = vector.broadcast %247 : vector<8x1xf32> to vector<8x32xf32>
    %256 = arith.subf %239, %255 : vector<8x32xf32>
    %cst_123 = arith.constant 9.99999974E-6 : f32
    %257 = vector.broadcast %cst_123 : f32 to vector<8x1xf32>
    %258 = arith.addf %254, %257 : vector<8x1xf32>
    %259 = math.rsqrt %258 : vector<8x1xf32>
    %260 = vector.broadcast %259 : vector<8x1xf32> to vector<8x32xf32>
    %261 = arith.mulf %256, %260 : vector<8x32xf32>
    %262 = vector.broadcast %241 : vector<1x32xf32> to vector<8x32xf32>
    %263 = arith.mulf %261, %262 : vector<8x32xf32>
    %264 = vector.broadcast %243 : vector<1x32xf32> to vector<8x32xf32>
    %265 = arith.addf %263, %264 : vector<8x32xf32>
    %266 = vector.extract_strided_slice %265 {offsets = [0, 0], sizes = [4, 32], strides = [1, 1]} : vector<8x32xf32> to vector<4x32xf32>
    %267 = arith.truncf %266 : vector<4x32xf32> to vector<4x32xbf16>
    %c0_124 = arith.constant 0 : index
    %c0_125 = arith.constant 0 : index
    %268 = vector.load %arg14[%c0_124, %c0_125] : memref<2x32xbf16, #tpu.memory_space<vmem>>, vector<2x32xbf16>
    %cst_126 = arith.constant dense<0.000000e+00> : vector<2x4xf32>
    %269 = tpu.matmul %268, %267, %cst_126 {dimension_numbers = #tpu.dot_dimension_numbers<[1], [1], [0], [0], [0, 0, 1, 0], [], []>} : vector<2x32xbf16>, vector<4x32xbf16>, vector<2x4xf32> -> vector<2x4xf32>
    %c0_127 = arith.constant 0 : index
    %c0_128 = arith.constant 0 : index
    %270 = vector.load %arg15[%c0_127, %c0_128] : memref<2x1xf32, #tpu.memory_space<vmem>>, vector<2x1xf32>
    %271 = vector.broadcast %270 : vector<2x1xf32> to vector<2x4xf32>
    %272 = arith.addf %269, %271 : vector<2x4xf32>
    %273 = vector.extract_strided_slice %272 {offsets = [0, 0], sizes = [1, 4], strides = [1, 1]} : vector<2x4xf32> to vector<1x4xf32>
    %274 = vector.extract_strided_slice %272 {offsets = [1, 0], sizes = [1, 4], strides = [1, 1]} : vector<2x4xf32> to vector<1x4xf32>
    %275 = math.exp %274 : vector<1x4xf32>
    %c0_129 = arith.constant 0 : index
    %c0_130 = arith.constant 0 : index
    %c0_131 = arith.constant 0 : index
    %276 = vector.load %arg16[%c0_129, %c0_130, %c0_131] : memref<1x1x4xf32, #tpu.memory_space<vmem>>, vector<1x1x4xf32>
    %277 = vector.shape_cast %276 : vector<1x1x4xf32> to vector<1x4xf32>
    %278 = arith.mulf %275, %277 : vector<1x4xf32>
    %279 = arith.addf %273, %278 : vector<1x4xf32>
    %280 = math.tanh %279 : vector<1x4xf32>
    %281 = tpu.concatenate %273, %275, %280 in 0 : vector<1x4xf32>, vector<1x4xf32>, vector<1x4xf32> -> vector<3x4xf32>
    %c0_132 = arith.constant 0 : index
    %c0_133 = arith.constant 0 : index
    %c0_134 = arith.constant 0 : index
    %282 = vector.load %arg17[%c0_132, %c0_133, %c0_134] : memref<1x3x4xf32, #tpu.memory_space<vmem>>, vector<1x3x4xf32>
    %283 = vector.shape_cast %282 : vector<1x3x4xf32> to vector<3x4xf32>
    %284 = vector.shape_cast %281 : vector<3x4xf32> to vector<1x3x4xf32>
    tpu.vector_store %arg17[%c0_132, %c0_133, %c0_134], %284 {strides = array<i32>} : memref<1x3x4xf32, #tpu.memory_space<vmem>>, vector<1x3x4xf32>,
    return
  }
  func.func @transform_0(%arg0: i32) -> (i32, i32, i32) {
    %c0_i32 = arith.constant 0 : i32
    %c0_i32_0 = arith.constant 0 : i32
    %c0_i32_1 = arith.constant 0 : i32
    return %arg0, %c0_i32, %c0_i32_0 : i32, i32, i32
  }
  func.func @transform_1(%arg0: i32) -> (i32, i32, i32) {
    %c0_i32 = arith.constant 0 : i32
    %c0_i32_0 = arith.constant 0 : i32
    %c0_i32_1 = arith.constant 0 : i32
    %c0_i32_2 = arith.constant 0 : i32
    return %c0_i32, %c0_i32_0, %c0_i32_1 : i32, i32, i32
  }
  func.func @transform_2(%arg0: i32) -> (i32, i32, i32) {
    %c0_i32 = arith.constant 0 : i32
    %c0_i32_0 = arith.constant 0 : i32
    %c0_i32_1 = arith.constant 0 : i32
    %c0_i32_2 = arith.constant 0 : i32
    return %c0_i32, %c0_i32_0, %c0_i32_1 : i32, i32, i32
  }
  func.func @transform_3(%arg0: i32) -> (i32, i32, i32) {
    %c0_i32 = arith.constant 0 : i32
    %c0_i32_0 = arith.constant 0 : i32
    %c0_i32_1 = arith.constant 0 : i32
    %c0_i32_2 = arith.constant 0 : i32
    return %c0_i32, %c0_i32_0, %c0_i32_1 : i32, i32, i32
  }
  func.func @transform_4(%arg0: i32) -> (i32, i32, i32) {
    %c0_i32 = arith.constant 0 : i32
    %c0_i32_0 = arith.constant 0 : i32
    %c0_i32_1 = arith.constant 0 : i32
    %c0_i32_2 = arith.constant 0 : i32
    return %c0_i32, %c0_i32_0, %c0_i32_1 : i32, i32, i32
  }
  func.func @transform_5(%arg0: i32) -> (i32, i32, i32) {
    %c0_i32 = arith.constant 0 : i32
    %c0_i32_0 = arith.constant 0 : i32
    %c0_i32_1 = arith.constant 0 : i32
    %c0_i32_2 = arith.constant 0 : i32
    return %c0_i32, %c0_i32_0, %c0_i32_1 : i32, i32, i32
  }
  func.func @transform_6(%arg0: i32) -> (i32, i32, i32) {
    %c0_i32 = arith.constant 0 : i32
    %c0_i32_0 = arith.constant 0 : i32
    %c0_i32_1 = arith.constant 0 : i32
    %c0_i32_2 = arith.constant 0 : i32
    return %c0_i32, %c0_i32_0, %c0_i32_1 : i32, i32, i32
  }
  func.func @transform_7(%arg0: i32) -> (i32, i32, i32) {
    %c0_i32 = arith.constant 0 : i32
    %c0_i32_0 = arith.constant 0 : i32
    %c0_i32_1 = arith.constant 0 : i32
    %c0_i32_2 = arith.constant 0 : i32
    return %c0_i32, %c0_i32_0, %c0_i32_1 : i32, i32, i32
  }
  func.func @transform_8(%arg0: i32) -> (i32, i32, i32) {
    %c0_i32 = arith.constant 0 : i32
    %c0_i32_0 = arith.constant 0 : i32
    %c0_i32_1 = arith.constant 0 : i32
    %c0_i32_2 = arith.constant 0 : i32
    return %c0_i32, %c0_i32_0, %c0_i32_1 : i32, i32, i32
  }
  func.func @transform_9(%arg0: i32) -> (i32, i32, i32) {
    %c0_i32 = arith.constant 0 : i32
    %c0_i32_0 = arith.constant 0 : i32
    %c0_i32_1 = arith.constant 0 : i32
    %c0_i32_2 = arith.constant 0 : i32
    return %c0_i32, %c0_i32_0, %c0_i32_1 : i32, i32, i32
  }
  func.func @transform_10(%arg0: i32) -> (i32, i32, i32) {
    %c0_i32 = arith.constant 0 : i32
    %c0_i32_0 = arith.constant 0 : i32
    %c0_i32_1 = arith.constant 0 : i32
    %c0_i32_2 = arith.constant 0 : i32
    return %c0_i32, %c0_i32_0, %c0_i32_1 : i32, i32, i32
  }
  func.func @transform_11(%arg0: i32) -> (i32, i32, i32) {
    %c0_i32 = arith.constant 0 : i32
    %c0_i32_0 = arith.constant 0 : i32
    %c0_i32_1 = arith.constant 0 : i32
    %c0_i32_2 = arith.constant 0 : i32
    return %c0_i32, %c0_i32_0, %c0_i32_1 : i32, i32, i32
  }
  func.func @transform_12(%arg0: i32) -> (i32, i32, i32) {
    %c0_i32 = arith.constant 0 : i32
    %c0_i32_0 = arith.constant 0 : i32
    %c0_i32_1 = arith.constant 0 : i32
    %c0_i32_2 = arith.constant 0 : i32
    return %c0_i32, %c0_i32_0, %c0_i32_1 : i32, i32, i32
  }
  func.func @transform_13(%arg0: i32) -> (i32, i32) {
    %c0_i32 = arith.constant 0 : i32
    %c0_i32_0 = arith.constant 0 : i32
    %c0_i32_1 = arith.constant 0 : i32
    return %c0_i32, %c0_i32_0 : i32, i32
  }
  func.func @transform_14(%arg0: i32) -> (i32, i32) {
    %c0_i32 = arith.constant 0 : i32
    %c0_i32_0 = arith.constant 0 : i32
    %c0_i32_1 = arith.constant 0 : i32
    return %c0_i32, %c0_i32_0 : i32, i32
  }
  func.func @transform_15(%arg0: i32) -> (i32, i32, i32) {
    %c0_i32 = arith.constant 0 : i32
    %c0_i32_0 = arith.constant 0 : i32
    %c0_i32_1 = arith.constant 0 : i32
    return %arg0, %c0_i32, %c0_i32_0 : i32, i32, i32
  }
  func.func @transform_16(%arg0: i32) -> (i32, i32, i32) {
    %c0_i32 = arith.constant 0 : i32
    %c0_i32_0 = arith.constant 0 : i32
    %c0_i32_1 = arith.constant 0 : i32
    return %arg0, %c0_i32, %c0_i32_0 : i32, i32, i32
  }
}

</mosaic_0001>

<bundles_post_ra>
// kernel: transformer_policy_net_forward.1
= control target key start
LH: loop header
LB: loop body
LE: loop exit
PB: predicated region body
PF: predicated region fallthrough
CT: control target
= control target key end

     0   :  { %s4966_s21 = smov 0   ;;  %s5828_s0 = inlined_call_operand.vmem [shape: f32[2,8,32], index: 0, kind: input, shape index: {}]   ;;  %s5829_s1 = inlined_call_operand.vmem [shape: bf16[2,32,96], index: 1, kind: input, shape index: {}]   ;;  %s5830_s2 = inlined_call_operand.vmem [shape: f32[2,1,96], index: 2, kind: input, shape index: {}]   ;;  %s5831_s3 = inlined_call_operand.vmem [shape: bf16[2,32,32], index: 3, kind: input, shape index: {}]   ;;  %s5832_s4 = inlined_call_operand.vmem [shape: f32[2,1,32], index: 4, kind: input, shape index: {}]   ;;  %s5833_s5 = inlined_call_operand.vmem [shape: f32[2,1,32], index: 5, kind: input, shape index: {}]   ;;  %s5834_s6 = inlined_call_operand.vmem [shape: f32[2,1,32], index: 6, kind: input, shape index: {}]   ;;  %s5835_s7 = inlined_call_operand.vmem [shape: bf16[2,32,2048], index: 7, kind: input, shape index: {}]   ;;  %s5836_s8 = inlined_call_operand.vmem [shape: f32[2,1,2048], index: 8, kind: input, shape index: {}]   ;;  %s5837_s9 = inlined_call_operand.vmem [shape: bf16[2,32,2048], index: 9, kind: input, shape index: {}]   ;;  %s5838_s10 = inlined_call_operand.vmem [shape: f32[2,1,32], index: 10, kind: input, shape index: {}]   ;;  %s5839_s11 = inlined_call_operand.vmem [shape: f32[2,1,32], index: 11, kind: input, shape index: {}]   ;;  %s5840_s12 = inlined_call_operand.vmem [shape: f32[2,1,32], index: 12, kind: input, shape index: {}]   ;;  %s5841_s13 = inlined_call_operand.vmem [shape: bf16[2,32], index: 13, kind: input, shape index: {}]   ;;  %s5842_s14 = inlined_call_operand.vmem [shape: f32[2,1], index: 14, kind: input, shape index: {}]   ;;  %s5843_s15 = inlined_call_operand.vmem [shape: f32[2,1,4], index: 15, kind: input, shape index: {}]   ;;  %s5844_s16 = inlined_call_operand.vmem [shape: f32[2,3,4], index: 16, kind: output, shape index: {}]  }
   0x1   :  { %5856 = sst [smem:[#allocation2_spill]] %s5828_s0 }
   0x2 LB: > { %s4319_s22 = sadd.s32 4294967295, %s4862_s21   ;;  %p4323_p0 = scmp.ge.s32.totalorder %s4862_s21, 1  ;;  %s4862_s21 = sphi %s4966_s21, %s26_s21  }
   0x3   : > { %p469_p1 = scmp.lt.s32.totalorder %s4862_s21, 3 }
   0x5   : > { %p470_p2 = pnand %p4323_p0, %p469_p1 }
   0x6   : > { %v4804_v0 = vld [vmem:[%s5829_s1] sm:$0xff] (!%p470_p2)   ;;  %v4864_v1 = vmov (!%p470_p2), 0.0   ;;  %v4805_v2 = vld [vmem:[%s5829_s1 + $0x8] sm:$0xff] (!%p470_p2)   ;;  %vm4865_vm0 = vmmov (!%p470_p2), 0   ;;  %p520_p3 = scmp.lt.s32.totalorder (!%p470_p2), %s4319_s22, 1  ;;  %s5857_s30 = sld [smem:[#allocation2_spill]] (!%p470_p2) }
   0x7   : > { %473 = sbr.rel (%p470_p2) target bundleno = 5363 (0x14f3), region = 84  ;;  %4643 = vmatprep.subr.bf16.mxu0 (!%p470_p2), %v4864_v1  ;;  %4651 = vmatprep.subr.bf16.mxu1 (!%p470_p2), %v4864_v1  ;;  %vm557_vm1 = vcmask (!%p470_p2), 261120   ;;  %v4326_v5 = vld [vmem:[%s5830_s2] ss:$0 sm:$0xff] (!%p470_p2)  ;;  %s5855_s19 = smov (!%p470_p2), 120   ;;  %vm605_vm2 = vcmask (!%p470_p2), 64512  }
   0x8   : > { %4644 = vmatpush3.bf16.msra.mxu0 (!%p470_p2), %v4804_v0  ;;  %4647 = vmatprep.mubr.msk.bf16.mxu0 (!%p470_p2), %vm4865_vm0, %v4864_v1  ;;  %s4867_s20 = smov (!%p470_p2), 96   ;;  %s5853_s23 = smov (!%p470_p2), 80   ;;  %vm857_vm3 = vcmask (!%p470_p2), 1043456   ;;  %vm1062_vm4 = vcmask (!%p470_p2), 130048   ;;  %vm1064_vm5 = vcmask (!%p470_p2), 195584   ;;  %vm4251_vm6 = vcmask (!%p470_p2), 1040384  }
   0x9   : > { %4645 = vmatprep.subr.bf16.mxu0 (!%p470_p2), %v4864_v1  ;;  %4653 = vmatprep.mubr.msk.bf16.mxu1 (!%p470_p2), %vm4865_vm0, %v4864_v1  ;;  %s4869_s24 = smov (!%p470_p2), 88   ;;  %s5852_s25 = smov (!%p470_p2), 112   ;;  %vm4253_vm7 = vcmask (!%p470_p2), 1041408   ;;  %vm4255_vm8 = vcmask (!%p470_p2), 26624  }
   0xa   : > { %s4871_s26 = smov (!%p470_p2), 72   ;;  %s5851_s28 = smov (!%p470_p2), 56  }
   0xb   : > { %s5847_s29 = smov (!%p470_p2), 64   ;;  %s5849_s17 = smov (!%p470_p2), 16  }
   0xc   : > { %4646 = vmatpush3.bf16.msra.mxu0 (!%p470_p2), %v4805_v2  ;;  %s5866_s18 = smov (!%p470_p2), 8  }
   0xd   : > { %4657 = vmatprep.subr.bf16.mxu0 (!%p470_p2), %v4864_v1 }
   0xe   : > { %s5870_s22 = smov (!%p520_p3, %s4319_s22), 1 }
   0xf   : > { %s4324_s27 = sshll.u32 %s5870_s22, 3 }
  0x10   : > { %s523_s0 = scalar_lea.vmem %s5857_s30, %s4324_s27  ;;  %s5854_s27 = smov 104  }
  0x11   : > { %v4994_v3 = vld [vmem:[%s523_s0] sm:$0xff]  ;;  %s5846_s30 = smov 48   ;;  %s5845_s0 = smov 40  }
  0x12   : > { %v533_v4 = vpack.c.bf16 %v4994_v3, %v4994_v3 }
  0x14   : > { %4648 = vmatmul.mubr.msk.bf16.vlgmr.msra.gmra.mrb[0].mxu0 %vm557_vm1, %v533_v4 }
  0x15   : > { %4659 = vmatprep.mubr.msk.bf16.mxu0 %vm4865_vm0, %v4864_v1 }
  0xe7   : > { %v595_v6 = vpop.f32.mrb[0].mxu0 }
  0xe8   : > { %v596_v7 = vadd.f32 %v4326_v5, %v595_v6  ;;  %v4649_v8 = vpop.f32.mrb[1].mxu0 }
  0xe9   : > { %v598_v9 = vpop.f32.mrb[2].mxu0 }
  0xea   : > { %v5004_v10 = vpack.c.bf16 %v596_v7, %v596_v7  ;;  %v4650_v11 = vpop.f32.mrb[3].mxu0 }
  0xec   : > { %652 = vrot.lane.b32.xlu1 %v5004_v10, %s5855_s19  ;;  %603 = vrot.lane.b32.xlu0 %v5004_v10, %s4867_s20  ;;  %s5860_s19 = smov 80  }
  0xf0   : > { %704 = vrot.lane.b32.xlu1 %v5004_v10, %s5853_s23  ;;  %654 = vrot.lane.b32.xlu0 %v5004_v10, %s4869_s24  ;;  %s5865_s23 = smov 40  }
  0xf4   : > { %702 = vrot.lane.b32.xlu1 %v5004_v10, %s5852_s25  ;;  %754 = vrot.lane.b32.xlu0 %v5004_v10, %s4871_s26 }
  0xf8   : > { %752 = vrot.lane.b32.xlu0 %v5004_v10, %s5854_s27  ;;  %s5861_s27 = smov 112  }
 0x15e   : > { %v653_v12 = vpop.permute.xlu1 %652  ;;  %v604_v13 = vpop.permute.xlu0 %603 }
 0x15f   : > { %v610_v14 = vsel %vm605_vm2, %v604_v13, 0 }
 0x160   : > { %4652 = vmatpush3.bf16.xpose.msra.mxu1 %v610_v14 }
 0x161   : > { %4663 = vmatprep.subr.bf16.mxu1 %v4864_v1 }
 0x162   : > { %v655_v15 = vpop.permute.xlu0 %654  ;;  %v705_v17 = vpop.permute.xlu1 %704 }
 0x163   : > { %v660_v16 = vsel %vm605_vm2, %v655_v15, 0  ;;  %v710_v18 = vsel %vm605_vm2, %v705_v17, 0 }
 0x164   : > { %4658 = vmatpush3.bf16.xpose.msra.mxu0 %v660_v16 }
 0x165   : > { %4669 = vmatprep.subr.bf16.mxu0 %v4864_v1 }
 0x166   : > { %v755_v19 = vpop.permute.xlu0 %754  ;;  %v703_v21 = vpop.permute.xlu1 %702 }
 0x167   : > { %4654 = vmatmul.mubr.msk.bf16.vlgmr.msra.gmra.mrb[0].mxu1 %vm605_vm2, %v5004_v10  ;;  %v760_v20 = vsel %vm605_vm2, %v755_v19, 0 }
 0x168   : > { %4664 = vmatpush3.bf16.xpose.msra.mxu1 %v710_v18  ;;  %4665 = vmatprep.mubr.msk.bf16.mxu1 %vm4865_vm0, %v4864_v1 }
 0x169   : > { %4675 = vmatprep.subr.bf16.mxu1 %v4864_v1 }
 0x16a   : > { %v753_v22 = vpop.permute.xlu0 %752 }
 0x16b   : > { %4660 = vmatmul.mubr.msk.bf16.vlgmr.msra.gmra.mrb[4].mxu0 %vm605_vm2, %v653_v12 }
 0x16c   : > { %4670 = vmatpush3.bf16.xpose.msra.mxu0 %v760_v20  ;;  %4671 = vmatprep.mubr.msk.bf16.mxu0 %vm4865_vm0, %v4864_v1 }
 0x16d   : > { %4681 = vmatprep.subr.bf16.mxu0 %v4864_v1 }
 0x16f   : > { %4666 = vmatmul.mubr.msk.bf16.vlgmr.msra.gmra.mrb[4].mxu1 %vm605_vm2, %v703_v21 }
 0x170   : > { %4677 = vmatprep.mubr.msk.bf16.mxu1 %vm4865_vm0, %v4864_v1 }
 0x173   : > { %4672 = vmatmul.mubr.msk.bf16.vlgmr.msra.gmra.mrb[8].mxu0 %vm605_vm2, %v753_v22 }
 0x174   : > { %4683 = vmatprep.mubr.msk.bf16.mxu0 %vm4865_vm0, %v4864_v1 }
 0x23a   : > { %v646_v23 = vpop.f32.mrb[0].mxu1 }
 0x23b   : > { %v802_v24 = vmul.f32 0.35355338, %v646_v23  ;;  %v4655_v25 = vpop.f32.mrb[1].mxu1 }
 0x23c   : > { %v649_v26 = vpop.f32.mrb[2].mxu1 }
 0x23d   : > { %v4656_v27 = vpop.f32.mrb[3].mxu1  ;;  %v806_v28 = vsel %vm605_vm2, %v802_v24, -inf }
 0x23e   : > { %807 = vmax.xlane.f32.xlu1 %v806_v28  ;;  %v696_v29 = vpop.f32.mrb[4].mxu0 }
 0x23f   : > { %v803_v30 = vmul.f32 0.35355338, %v696_v29  ;;  %v4661_v31 = vpop.f32.mrb[5].mxu0  ;;  %v4806_v29 = vld [vmem:[%s5831_s3] sm:$0xff]  }
 0x240   : > { %v699_v32 = vpop.f32.mrb[6].mxu0 }
 0x241   : > { %v4662_v33 = vpop.f32.mrb[7].mxu0  ;;  %v809_v34 = vsel %vm605_vm2, %v803_v30, -inf }
 0x242   : > { %v746_v35 = vpop.f32.mrb[4].mxu1  ;;  %810 = vmax.xlane.f32.xlu0 %v809_v34 }
 0x243   : > { %v804_v36 = vmul.f32 0.35355338, %v746_v35  ;;  %v4667_v37 = vpop.f32.mrb[5].mxu1 }
 0x244   : > { %v749_v38 = vpop.f32.mrb[6].mxu1 }
 0x245   : > { %v4668_v39 = vpop.f32.mrb[7].mxu1  ;;  %v812_v40 = vsel %vm605_vm2, %v804_v36, -inf }
 0x246   : > { %813 = vmax.xlane.f32.xlu0 %v812_v40  ;;  %v796_v41 = vpop.f32.mrb[8].mxu0 }
 0x247   : > { %v805_v42 = vmul.f32 0.35355338, %v796_v41  ;;  %v4673_v43 = vpop.f32.mrb[9].mxu0 }
 0x248   : > { %v799_v44 = vpop.f32.mrb[10].mxu0 }
 0x249   : > { %v4674_v45 = vpop.f32.mrb[11].mxu0  ;;  %v815_v46 = vsel %vm605_vm2, %v805_v42, -inf }
 0x24a   : > { %816 = vmax.xlane.f32.xlu1 %v815_v46 }
 0x25b   : > { %903 = vrot.lane.b32.xlu1 %v5004_v10, %s5851_s28  ;;  %s5858_s28 = smov 120  }
 0x25c   : > { %852 = vrot.lane.b32.xlu0 %v5004_v10, %s5847_s29  ;;  %s5850_s29 = smov 8  }
 0x2cb   : > { %v808_v47 = vpop.xlane.xlu1 %807 }
 0x2cc   : > { %v818_v48 = vsub.f32 %v802_v24, %v808_v47 }
 0x2ce   : > { %v822_v49 = vmul.f32 1.442695, %v818_v48 }
 0x2cf   : > { %v811_v50 = vpop.xlane.xlu0 %810 }
 0x2d0   : > { %4812 = vpow2.f32 %v822_v49  ;;  %v819_v51 = vsub.f32 %v803_v30, %v811_v50  ;;  %v4807_v30 = vld [vmem:[%s5831_s3 + $0x8] sm:$0xff]  }
 0x2d2   : > { %v824_v52 = vmul.f32 1.442695, %v819_v51 }
 0x2d3   : > { %v814_v53 = vpop.xlane.xlu0 %813 }
 0x2d4   : > { %4814 = vpow2.f32 %v824_v52  ;;  %v820_v54 = vsub.f32 %v804_v36, %v814_v53 }
 0x2d6   : > { %v826_v55 = vmul.f32 1.442695, %v820_v54  ;;  %v4338_v54 = vld [vmem:[%s5832_s4] ss:$0 sm:$0xff] }
 0x2d7   : > { %v853_v56 = vpop.permute.xlu0 %852  ;;  %v817_v57 = vpop.xlane.xlu1 %816 }
 0x2d8   : > { %4816 = vpow2.f32 %v826_v55  ;;  %v859_v58 = vsel %vm857_vm3, %v853_v56, 0  ;;  %v821_v59 = vsub.f32 %v805_v42, %v817_v57 }
 0x2d9   : > { %4676 = vmatpush3.bf16.msra.mxu1 %v859_v58 }
 0x2da   : > { %v4813_v60 = vpop.eup %4812  ;;  %v828_v61 = vmul.f32 1.442695, %v821_v59  ;;  %4687 = vmatprep.subr.bf16.mxu1 %v4864_v1 }
 0x2db   : > { %v904_v62 = vpop.permute.xlu1 %903  ;;  %v830_v63 = vsel %vm605_vm2, %v4813_v60, 0.0 }
 0x2dc   : > { %4818 = vpow2.f32 %v828_v61  ;;  %v909_v0 = vsel %vm857_vm3, %v904_v62, 0  ;;  %831 = vadd.xlane.f32.xlu0 %v830_v63 }
 0x2dd   : > { %4682 = vmatpush3.bf16.msra.mxu0 %v909_v0 }
 0x2de   : > { %v4815_v2 = vpop.eup %4814  ;;  %4693 = vmatprep.subr.bf16.mxu0 %v4864_v1 }
 0x2df   : > { %v833_v4 = vsel %vm605_vm2, %v4815_v2, 0.0 }
 0x2e0   : > { %834 = vadd.xlane.f32.xlu1 %v833_v4 }
 0x2e2   : > { %v4817_v5 = vpop.eup %4816 }
 0x2e3   : > { %v836_v6 = vsel %vm605_vm2, %v4817_v5, 0.0 }
 0x2e4   : > { %837 = vadd.xlane.f32.xlu0 %v836_v6  ;;  %v1173_v6 = vld [vmem:[%s5835_s7 + $0x40] sm:$0xff] }
 0x2e6   : > { %v4819_v7 = vpop.eup %4818 }
 0x2e7   : > { %v839_v8 = vsel %vm605_vm2, %v4819_v7, 0.0 }
 0x2e8   : > { %840 = vadd.xlane.f32.xlu1 %v839_v8  ;;  %v1174_v8 = vld [vmem:[%s5835_s7 + $0x48] sm:$0xff] }
 0x2f9   : > { %951 = vrot.lane.b32.xlu1 %v5004_v10, %s5846_s30  ;;  %s5848_s30 = smov 24  }
 0x2fa   : > { %1001 = vrot.lane.b32.xlu0 %v5004_v10, %s5845_s0  ;;  %s4325_s0 = sshll.u32 %s5870_s22, 2 }
 0x369   : > { %v832_v9 = vpop.xlane.xlu0 %831 }
 0x36a   : > { %4820 = vrcp.f32 %v832_v9 }
 0x36d   : > { %v835_v11 = vpop.xlane.xlu1 %834 }
 0x36e   : > { %4822 = vrcp.f32 %v835_v11 }
 0x371   : > { %v838_v12 = vpop.xlane.xlu0 %837 }
 0x372   : > { %4824 = vrcp.f32 %v838_v12 }
 0x374   : > { %v4821_v14 = vpop.eup %4820 }
 0x375   : > { %v841_v13 = vpop.xlane.xlu1 %840  ;;  %v843_v16 = vmul.f32 %v4821_v14, %v4813_v60  ;;  %v1002_v20 = vpop.permute.xlu0 %1001  ;;  %v1189_v14 = vld [vmem:[%s5835_s7 + $0xc0] sm:$0xff] }
 0x376   : > { %4826 = vrcp.f32 %v841_v13  ;;  %v1007_v23 = vsel %vm857_vm3, %v1002_v20, 0  ;;  %v1181_v13 = vld [vmem:[%s5835_s7 + $0x80] sm:$0xff] }
 0x378   : > { %v4823_v15 = vpop.eup %4822 }
 0x379   : > { %v845_v17 = vmul.f32 %v4823_v15, %v4815_v2  ;;  %v952_v18 = vpop.permute.xlu1 %951  ;;  %v1182_v15 = vld [vmem:[%s5835_s7 + $0x88] sm:$0xff] }
 0x37a   : > { %v957_v21 = vsel %vm857_vm3, %v952_v18, 0  ;;  %v4360_v18 = vcombine.low %v1181_v13, %v1189_v14 }
 0x37b   : > { %v850_v19 = vpack.c.bf16 %v845_v17, %v843_v16  ;;  %v4361_v16 = vcombine.high %v1181_v13, %v1189_v14  ;;  %v1190_v17 = vld [vmem:[%s5835_s7 + $0xc8] sm:$0xff] }
 0x37c   : > { %v4825_v22 = vpop.eup %4824  ;;  %v4363_v20 = vcombine.high %v1182_v15, %v1190_v17 }
 0x37d   : > { %4678 = vmatmul.mubr.msk.bf16.vlgmr.msra.gmra.mrb[8].mxu1 %vm605_vm2, %v850_v19  ;;  %v902_v10 = vrot.slane %v850_v19, 4  ;;  %v847_v25 = vmul.f32 %v4825_v22, %v4817_v5  ;;  %v1165_v5 = vld [vmem:[%s5835_s7] sm:$0xff]  ;;  %v4362_v19 = vcombine.low %v1182_v15, %v1190_v17  ;;  %v1168_v22 = vld [vmem:[%s5835_s7 + $0x18] sm:$0xff]  ;;  %v1805_v17 = vld [vmem:[%s5837_s9 + $0x8] sm:$0xff] }
 0x37e   : > { %4688 = vmatpush3.bf16.msra.mxu1 %v957_v21  ;;  %4689 = vmatprep.mubr.msk.bf16.mxu1 %vm4865_vm0, %v4864_v1  ;;  %v4344_v9 = vcombine.low %v1165_v5, %v1173_v6  ;;  %v1167_v21 = vld [vmem:[%s5835_s7 + $0x10] sm:$0xff]  ;;  %v1804_v15 = vld [vmem:[%s5837_s9] sm:$0xff] }
 0x37f   : > { %4684 = vmatmul.mubr.msk.bf16.vlgmr.msra.gmra.mrb[12].mxu0 %vm605_vm2, %v902_v10  ;;  %4699 = vmatprep.subr.bf16.mxu1 %v4864_v1  ;;  %v1175_v10 = vld [vmem:[%s5835_s7 + $0x50] sm:$0xff] }
 0x380   : > { %v4827_v24 = vpop.eup %4826  ;;  %4694 = vmatpush3.bf16.msra.mxu0 %v1007_v23  ;;  %4695 = vmatprep.mubr.msk.bf16.mxu0 %vm4865_vm0, %v4864_v1  ;;  %v4880_v23 = vmov 0  }
 0x381   : > { %v849_v26 = vmul.f32 %v4827_v24, %v4819_v7  ;;  %v4345_v7 = vcombine.high %v1165_v5, %v1173_v6  ;;  %v4349_v24 = vcombine.high %v1167_v21, %v1175_v10  ;;  %4802 = vset.pattern.permute.xlu1 %v4880_v23  ;;  %4803 = vset.pattern.permute.xlu0 %v4880_v23 }
 0x383   : > { %v851_v27 = vpack.c.bf16 %v849_v26, %v847_v25  ;;  %1444 = vmatprep.subr.bf16.mxu0 %v4345_v7  ;;  %v1176_v25 = vld [vmem:[%s5835_s7 + $0x58] sm:$0xff]  ;;  %v4348_v26 = vcombine.low %v1167_v21, %v1175_v10  ;;  %v1195_v7 = vld [vmem:[%s5835_s7 + $0xf0] sm:$0xff] }
 0x385   : > { %4690 = vmatmul.mubr.msk.bf16.vlgmr.msra.gmra.mrb[12].mxu1 %vm605_vm2, %v851_v27  ;;  %v1000_v28 = vrot.slane %v851_v27, 4  ;;  %v4350_v27 = vcombine.low %v1168_v22, %v1176_v25 }
 0x386   : > { %4703 = vmatprep.mubr.msk.bf16.mxu1 %vm4865_vm0, %v4864_v1  ;;  %4700 = vmatpush3.bf16.msra.mxu1 %v4806_v29 }
 0x387   : > { %4696 = vmatmul.mubr.msk.bf16.vlgmr.msra.gmra.mrb[16].mxu0 %vm605_vm2, %v1000_v28  ;;  %4701 = vmatprep.subr.bf16.mxu1 %v4864_v1  ;;  %v4351_v28 = vcombine.high %v1168_v22, %v1176_v25  ;;  %v1820_v25 = vld [vmem:[%s5837_s9 + $0x80] sm:$0xff] }
 0x388   : > { %1445 = vmatpush1.bf16.msra.mxu0 %v4344_v9  ;;  %1476 = vmatprep.mubr.bf16.mxu0 %v4880_v23  ;;  %v1196_v9 = vld [vmem:[%s5835_s7 + $0xf8] sm:$0xff] }
 0x389   : > { %1446 = vmatprep.subr.bf16.mxu0 %v4361_v16  ;;  %v1812_v16 = vld [vmem:[%s5837_s9 + $0x40] sm:$0xff] }
 0x38a   : > { %4702 = vmatpush3.bf16.msra.mxu1 %v4807_v30  ;;  %v4386_v21 = vcombine.high %v1804_v15, %v1812_v16  ;;  %v4385_v22 = vcombine.low %v1804_v15, %v1812_v16 }
 0x38c   : > { %1447 = vmatpush1.bf16.msra.mxu0 %v4360_v18  ;;  %v1813_v18 = vld [vmem:[%s5837_s9 + $0x48] sm:$0xff] }
 0x38d   : > { %1526 = vmatprep.subr.bf16.mxu0 %v4349_v24  ;;  %v4388_v10 = vcombine.high %v1805_v17, %v1813_v18  ;;  %v4387_v24 = vcombine.low %v1805_v17, %v1813_v18 }
 0x450   : > { %v895_v31 = vpop.f32.mrb[8].mxu1 }
 0x451   : > { %v4679_v32 = vpop.f32.mrb[9].mxu1 }
 0x452   : > { %v898_v33 = vpop.f32.mrb[10].mxu1  ;;  %v945_v34 = vpop.f32.mrb[12].mxu0 }
 0x453   : > { %v4680_v35 = vpop.f32.mrb[11].mxu1  ;;  %1050 = vrot.lane.b32.xlu1 %v945_v34, %s5850_s29  ;;  %v4685_v36 = vpop.f32.mrb[13].mxu0  ;;  %v4342_v33 = vld [vmem:[%s5833_s5] ss:$0 sm:$0xff]  ;;  %s5859_s29 = smov 104  }
 0x454   : > { %v948_v37 = vpop.f32.mrb[14].mxu0  ;;  %v4343_v35 = vld [vmem:[%s5834_s6] ss:$0 sm:$0xff] }
 0x455   : > { %v4686_v38 = vpop.f32.mrb[15].mxu0  ;;  %v1183_v37 = vld [vmem:[%s5835_s7 + $0x90] sm:$0xff] }
 0x456   : > { %v1191_v38 = vld [vmem:[%s5835_s7 + $0xd0] sm:$0xff] }
 0x458   : > { %v993_v39 = vpop.f32.mrb[12].mxu1 }
 0x459   : > { %1054 = vrot.lane.b32.xlu0 %v993_v39, %s5849_s17  ;;  %v4691_v40 = vpop.f32.mrb[13].mxu1  ;;  %v1184_v39 = vld [vmem:[%s5835_s7 + $0x98] sm:$0xff] }
 0x45a   : > { %v996_v41 = vpop.f32.mrb[14].mxu1  ;;  %v1043_v42 = vpop.f32.mrb[16].mxu0  ;;  %v1192_v40 = vld [vmem:[%s5835_s7 + $0xd8] sm:$0xff] }
 0x45b   : > { %v4692_v43 = vpop.f32.mrb[15].mxu1  ;;  %1058 = vrot.lane.b32.xlu1 %v1043_v42, %s5848_s30  ;;  %v4697_v44 = vpop.f32.mrb[17].mxu0  ;;  %s526_s30 = scalar_lea.vmem %s5843_s15, %s5870_s22 }
 0x45c   : > { %v1046_v45 = vpop.f32.mrb[18].mxu0  ;;  %v4365_v43 = vcombine.high %v1183_v37, %v1191_v38  ;;  %v4367_v44 = vcombine.high %v1184_v39, %v1192_v40 }
 0x45d   : > { %v4698_v46 = vpop.f32.mrb[19].mxu0  ;;  %v1169_v45 = vld [vmem:[%s5835_s7 + $0x20] sm:$0xff] }
 0x45e   : > { %v1177_v46 = vld [vmem:[%s5835_s7 + $0x60] sm:$0xff] }
 0x4c5   : > { %v1051_v47 = vpop.permute.xlu1 %1050 }
 0x4c6   : > { %v1061_v48 = vsel %vm605_vm2, %v895_v31, %v1051_v47  ;;  %v1170_v47 = vld [vmem:[%s5835_s7 + $0x28] sm:$0xff] }
 0x4cb   : > { %v1055_v49 = vpop.permute.xlu0 %1054 }
 0x4cc   : > { %v1063_v50 = vsel %vm1062_vm4, %v1061_v48, %v1055_v49  ;;  %v1178_v48 = vld [vmem:[%s5835_s7 + $0x68] sm:$0xff]  ;;  %v4364_v49 = vcombine.low %v1183_v37, %v1191_v38  ;;  %v1815_v37 = vld [vmem:[%s5837_s9 + $0x58] sm:$0xff] }
 0x4cd   : > { %v1059_v51 = vpop.permute.xlu1 %1058 }
 0x4ce   : > { %v1065_v52 = vsel %vm1064_vm5, %v1063_v50, %v1059_v51  ;;  %v4366_v50 = vcombine.low %v1184_v39, %v1192_v40  ;;  %v4353_v51 = vcombine.high %v1169_v45, %v1177_v46 }
 0x4cf   : > { %v1066_v53 = vpack.c.bf16 %v1065_v52, %v1065_v52  ;;  %v4355_v52 = vcombine.high %v1170_v47, %v1178_v48 }
 0x4d1   : > { %4704 = vmatmul.mubr.msk.bf16.vlgmr.msra.gmra.mrb[16].mxu1 %vm557_vm1, %v1066_v53  ;;  %v1185_v53 = vld [vmem:[%s5835_s7 + $0xa0] sm:$0xff] }
 0x4d2   : > { %1517 = vmatprep.mubr.bf16.mxu1 %v4880_v23 }
 0x5a4   : > { %v1127_v55 = vpop.f32.mrb[16].mxu1 }
 0x5a5   : > { %v1128_v56 = vadd.f32 %v4338_v54, %v1127_v55  ;;  %v4705_v57 = vpop.f32.mrb[17].mxu1  ;;  %v1193_v54 = vld [vmem:[%s5835_s7 + $0xe0] sm:$0xff]  ;;  %v1186_v55 = vld [vmem:[%s5835_s7 + $0xa8] sm:$0xff] }
 0x5a6   : > { %v1130_v58 = vpop.f32.mrb[18].mxu1  ;;  %v4352_v57 = vcombine.low %v1169_v45, %v1177_v46  ;;  %v5275_v46 = vld [vmem:[%s5836_s8] sm:$0xff] }
 0x5a7   : > { %v4706_v59 = vpop.f32.mrb[19].mxu1  ;;  %v1133_v60 = vadd.f32 %v1128_v56, %v4994_v3  ;;  %v1166_v3 = vld [vmem:[%s5835_s7 + $0x8] sm:$0xff]  ;;  %v4354_v58 = vcombine.low %v1170_v47, %v1178_v48 }
 0x5a8   : > { %v4346_v11 = vcombine.low %v1166_v3, %v1174_v8  ;;  %v4347_v12 = vcombine.high %v1166_v3, %v1174_v8  ;;  %v1194_v56 = vld [vmem:[%s5835_s7 + $0xe8] sm:$0xff]  ;;  %v4369_v59 = vcombine.high %v1185_v53, %v1193_v54  ;;  %v1187_v3 = vld [vmem:[%s5835_s7 + $0xb0] sm:$0xff]  ;;  %v1188_v8 = vld [vmem:[%s5835_s7 + $0xb8] sm:$0xff] }
 0x5a9   : > { %v1136_v61 = vsel %vm557_vm1, %v1133_v60, 0.0  ;;  %v4373_v13 = vcombine.high %v1187_v3, %v1195_v7  ;;  %v4375_v14 = vcombine.high %v1188_v8, %v1196_v9 }
 0x5aa   : > { %1137 = vadd.xlane.f32.xlu0 %v1136_v61  ;;  %1485 = vmatprep.subr.bf16.mxu1 %v4347_v12  ;;  %v1171_v61 = vld [vmem:[%s5835_s7 + $0x30] sm:$0xff] }
 0x5ab   : > { %1486 = vmatpush1.bf16.msra.mxu1 %v4346_v11 }
 0x5ac   : > { %1487 = vmatprep.subr.bf16.mxu1 %v4363_v20  ;;  %v4374_v20 = vcombine.low %v1188_v8, %v1196_v9  ;;  %v1830_v9 = vld [vmem:[%s5837_s9 + $0xd0] sm:$0xff] }
 0x5af   : > { %1488 = vmatpush1.bf16.msra.mxu1 %v4362_v19  ;;  %v4372_v19 = vcombine.low %v1187_v3, %v1195_v7  ;;  %v1822_v3 = vld [vmem:[%s5837_s9 + $0x90] sm:$0xff] }
 0x5b0   : > { %1567 = vmatprep.subr.bf16.mxu1 %v4351_v28 }
 0x637   : > { %v1138_v62 = vpop.xlane.xlu0 %1137 }
 0x638   : > { %v1140_v63 = vmul.f32 0.03125, %v1138_v62  ;;  %v1179_v62 = vld [vmem:[%s5835_s7 + $0x70] sm:$0xff] }
 0x639   : > { %v4357_v5 = vcombine.high %v1171_v61, %v1179_v62  ;;  %v4356_v11 = vcombine.low %v1171_v61, %v1179_v62 }
 0x63a   : > { %v1141_v0 = vsub.f32 %v1133_v60, %v1140_v63  ;;  %v4371_v60 = vcombine.high %v1186_v55, %v1194_v56  ;;  %v1172_v63 = vld [vmem:[%s5835_s7 + $0x38] sm:$0xff] }
 0x63c   : > { %v1142_v2 = vmul.f32 %v1141_v0, %v1141_v0 }
 0x63e   : > { %v1143_v4 = vsel %vm557_vm1, %v1142_v2, 0.0  ;;  %v4368_v2 = vcombine.low %v1185_v53, %v1193_v54 }
 0x63f   : > { %1144 = vadd.xlane.f32.xlu1 %v1143_v4  ;;  %v4370_v4 = vcombine.low %v1186_v55, %v1194_v56 }
 0x6cc   : > { %v1145_v29 = vpop.xlane.xlu1 %1144 }
 0x6cd   : > { %v1146_v30 = vmul.f32 0.03125, %v1145_v29  ;;  %v1829_v29 = vld [vmem:[%s5837_s9 + $0xc8] sm:$0xff] }
 0x6cf   : > { %v1147_v31 = vadd.f32 1e-05, %v1146_v30 }
 0x6d1   : > { %4828 = vrsqrt.f32 %v1147_v31 }
 0x6db   : > { %v4829_v32 = vpop.eup %4828 }
 0x6dc   : > { %v1149_v34 = vmul.f32 %v4829_v32, %v1141_v0  ;;  %v1180_v0 = vld [vmem:[%s5835_s7 + $0x78] sm:$0xff] }
 0x6dd   : > { %v4359_v6 = vcombine.high %v1172_v63, %v1180_v0  ;;  %v4358_v12 = vcombine.low %v1172_v63, %v1180_v0 }
 0x6de   : > { %v1156_v36 = vmul.f32 %v4342_v33, %v1149_v34  ;;  %v5255_v33 = vld [vmem:[%s5837_s9 + $0x10] sm:$0xff] }
 0x6df   : > { %v1814_v34 = vld [vmem:[%s5837_s9 + $0x50] sm:$0xff] }
 0x6e0   : > { %v5152_v41 = vadd.f32 %v4343_v35, %v1156_v36  ;;  %v1807_v35 = vld [vmem:[%s5837_s9 + $0x18] sm:$0xff]  ;;  %v4390_v36 = vcombine.high %v5255_v33, %v1814_v34  ;;  %v4389_v38 = vcombine.low %v5255_v33, %v1814_v34 }
 0x6e1   : > { %v4391_v39 = vcombine.low %v1807_v35, %v1815_v37  ;;  %v4392_v40 = vcombine.high %v1807_v35, %v1815_v37  ;;  %v5320_v35 = vld [vmem:[%s5836_s8 + $0x8] sm:$0xff] }
 0x6e2   : > { %v5156_v42 = vpack.c.bf16 %v5152_v41, %v5152_v41 }
 0x6e4   : > { %4376 = vmatmul.mubr.msk.bf16.vlgmr.msra.gmra.mrb[20].mxu0 %vm557_vm1, %v5156_v42  ;;  %4377 = vmatmul.mubr.msk.bf16.vlgmr.msra.gmra.mrb[20].mxu1 %vm557_vm1, %v5156_v42 }
 0x6e5   : > { %1527 = vmatpush1.bf16.msra.mxu0 %v4348_v26  ;;  %1568 = vmatpush1.bf16.msra.mxu1 %v4350_v27  ;;  %v1828_v26 = vld [vmem:[%s5837_s9 + $0xc0] sm:$0xff]  ;;  %v1821_v27 = vld [vmem:[%s5837_s9 + $0x88] sm:$0xff] }
 0x6e6   : > { %1528 = vmatprep.subr.bf16.mxu0 %v4365_v43  ;;  %1569 = vmatprep.subr.bf16.mxu1 %v4367_v44  ;;  %v4402_v28 = vcombine.high %v1820_v25, %v1828_v26  ;;  %v4401_v30 = vcombine.low %v1820_v25, %v1828_v26  ;;  %v4403_v31 = vcombine.low %v1821_v27, %v1829_v29 }
 0x6e7   : > { %1558 = vmatprep.mubr.bf16.mxu0 %v4880_v23  ;;  %1599 = vmatprep.mubr.bf16.mxu1 %v4880_v23  ;;  %v4404_v32 = vcombine.high %v1821_v27, %v1829_v29 }
 0x6e9   : > { %1529 = vmatpush1.bf16.msra.mxu0 %v4364_v49  ;;  %1570 = vmatpush1.bf16.msra.mxu1 %v4366_v50 }
 0x6ea   : > { %1608 = vmatprep.subr.bf16.mxu0 %v4353_v51  ;;  %1649 = vmatprep.subr.bf16.mxu1 %v4355_v52 }
 0x6ec   : > { %4378 = vmatmul.mubr.msk.bf16.vlgmr.msra.gmra.mrb[24].mxu0 %vm557_vm1, %v5156_v42  ;;  %4379 = vmatmul.mubr.msk.bf16.vlgmr.msra.gmra.mrb[24].mxu1 %vm557_vm1, %v5156_v42 }
 0x6ed   : > { %1609 = vmatpush1.bf16.msra.mxu0 %v4352_v57  ;;  %1650 = vmatpush1.bf16.msra.mxu1 %v4354_v58 }
 0x6ee   : > { %1610 = vmatprep.subr.bf16.mxu0 %v4369_v59  ;;  %1651 = vmatprep.subr.bf16.mxu1 %v4371_v60 }
 0x6ef   : > { %1640 = vmatprep.mubr.bf16.mxu0 %v4880_v23  ;;  %1681 = vmatprep.mubr.bf16.mxu1 %v4880_v23 }
 0x6f1   : > { %1611 = vmatpush1.bf16.msra.mxu0 %v4368_v2  ;;  %1652 = vmatpush1.bf16.msra.mxu1 %v4370_v4 }
 0x6f2   : > { %1690 = vmatprep.subr.bf16.mxu0 %v4357_v5  ;;  %1731 = vmatprep.subr.bf16.mxu1 %v4359_v6 }
 0x6f4   : > { %4380 = vmatmul.mubr.msk.bf16.vlgmr.msra.gmra.mrb[28].mxu0 %vm557_vm1, %v5156_v42  ;;  %4381 = vmatmul.mubr.msk.bf16.vlgmr.msra.gmra.mrb[28].mxu1 %vm557_vm1, %v5156_v42 }
 0x6f5   : > { %1691 = vmatpush1.bf16.msra.mxu0 %v4356_v11  ;;  %1732 = vmatpush1.bf16.msra.mxu1 %v4358_v12  ;;  %v1823_v11 = vld [vmem:[%s5837_s9 + $0x98] sm:$0xff] }
 0x6f6   : > { %1692 = vmatprep.subr.bf16.mxu0 %v4373_v13  ;;  %1733 = vmatprep.subr.bf16.mxu1 %v4375_v14  ;;  %v1831_v12 = vld [vmem:[%s5837_s9 + $0xd8] sm:$0xff] }
 0x6f7   : > { %1722 = vmatprep.mubr.bf16.mxu0 %v4880_v23  ;;  %1763 = vmatprep.mubr.bf16.mxu1 %v4880_v23 }
 0x6f9   : > { %1693 = vmatpush1.bf16.msra.mxu0 %v4372_v19  ;;  %1734 = vmatpush1.bf16.msra.mxu1 %v4374_v20 }
 0x6fa   : > { %2003 = vmatprep.subr.bf16.mxu0 %v4386_v21  ;;  %2043 = vmatprep.subr.bf16.mxu1 %v4388_v10  ;;  %v4406_v21 = vcombine.high %v1822_v3, %v1830_v9  ;;  %v4408_v10 = vcombine.high %v1823_v11, %v1831_v12 }
 0x6fc   : > { %4382 = vmatmul.mubr.msk.bf16.vlgmr.msra.gmra.mrb[32].mxu0 %vm557_vm1, %v5156_v42  ;;  %4383 = vmatmul.mubr.msk.bf16.vlgmr.msra.gmra.mrb[32].mxu1 %vm557_vm1, %v5156_v42  ;;  %v1201_v42 = vlaneseq }
 0x6fe   : > { %v1202_v43 = vshrl.u32 %v1201_v42, 7  ;;  %v1817_v42 = vld [vmem:[%s5837_s9 + $0x68] sm:$0xff] }
 0x700   : > { %v5268_v44 = vsub.s32 0, %v1202_v43  ;;  %v5270_v45 = vsub.s32 2, %v1202_v43  ;;  %v5277_v47 = vsub.s32 1, %v1202_v43  ;;  %v5279_v48 = vsub.s32 3, %v1202_v43 }
 0x701   : > { %v5289_v63 = vsub.s32 5, %v1202_v43  ;;  %v5291_v0 = vsub.s32 7, %v1202_v43  ;;  %v5305_v13 = vsub.s32 4, %v1202_v43  ;;  %v5307_v14 = vsub.s32 6, %v1202_v43 }
 0x702   : > { %2004 = vmatpush1.bf16.xpose.msra.mxu0 %v4385_v22  ;;  %2044 = vmatpush1.bf16.xpose.msra.mxu1 %v4387_v24  ;;  %v1204_v49 = vrot.slane %v5275_v46, %v5268_v44  ;;  %v1212_v50 = vrot.slane %v5275_v46, %v5270_v45  ;;  %v1208_v51 = vrot.slane %v5275_v46, %v5277_v47 }
 0x703   : > { %2005 = vmatprep.subr.bf16.mxu0 %v4402_v28  ;;  %2045 = vmatprep.subr.bf16.mxu1 %v4404_v32  ;;  %v1216_v52 = vrot.slane %v5275_v46, %v5279_v48  ;;  %v1224_v17 = vrot.slane %v5275_v46, %v5289_v63  ;;  %v1232_v18 = vrot.slane %v5275_v46, %v5291_v0 }
 0x704   : > { %v1228_v32 = vrot.slane %v5275_v46, %v5307_v14  ;;  %v4405_v43 = vcombine.low %v1822_v3, %v1830_v9 }
 0x70a   : > { %2006 = vmatpush1.bf16.xpose.msra.mxu0 %v4401_v30  ;;  %2046 = vmatpush1.bf16.xpose.msra.mxu1 %v4403_v31  ;;  %v1220_v31 = vrot.slane %v5275_v46, %v5305_v13  ;;  %v4407_v46 = vcombine.low %v1823_v11, %v1831_v12  ;;  %v1824_v11 = vld [vmem:[%s5837_s9 + $0xa0] sm:$0xff] }
 0x70b   : > { %2083 = vmatprep.subr.bf16.mxu0 %v4390_v36  ;;  %2123 = vmatprep.subr.bf16.mxu1 %v4392_v40  ;;  %v1808_v36 = vld [vmem:[%s5837_s9 + $0x20] sm:$0xff]  ;;  %v1809_v40 = vld [vmem:[%s5837_s9 + $0x28] sm:$0xff] }
 0x70c   : > { %v1832_v12 = vld [vmem:[%s5837_s9 + $0xe0] sm:$0xff] }
 0x7b7   : > { %v1478_v53 = vpop.f32.mrb[20].mxu0  ;;  %v1519_v54 = vpop.f32.mrb[20].mxu1 }
 0x7b8   : > { %v1479_v55 = vadd.f32 %v1478_v53, %v1204_v49  ;;  %v1520_v56 = vadd.f32 %v1519_v54, %v1212_v50  ;;  %v1480_v57 = vpop.f32.mrb[21].mxu0  ;;  %v1521_v58 = vpop.f32.mrb[21].mxu1 }
 0x7b9   : > { %v1481_v59 = vadd.f32 %v1480_v57, %v1208_v51  ;;  %v1522_v60 = vadd.f32 %v1521_v58, %v1216_v52  ;;  %v1482_v61 = vpop.f32.mrb[22].mxu0  ;;  %v1523_v62 = vpop.f32.mrb[22].mxu1  ;;  %v1240_v51 = vrot.slane %v5320_v35, %v5277_v47  ;;  %v1248_v52 = vrot.slane %v5320_v35, %v5279_v48 }
 0x7ba   : > { %v1772_v2 = vmax.f32 %v1479_v55, 0.0  ;;  %v1774_v4 = vmax.f32 %v1520_v56, 0.0  ;;  %v1483_v5 = vpop.f32.mrb[23].mxu0  ;;  %v1524_v6 = vpop.f32.mrb[23].mxu1  ;;  %v4396_v56 = vcombine.high %v1809_v40, %v1817_v42 }
 0x7bb   : > { %v1773_v7 = vmax.f32 %v1481_v59, 0.0  ;;  %v1775_v8 = vmax.f32 %v1522_v60, 0.0 }
 0x7bc   : > { %v1788_v19 = vpack.c.bf16 %v1772_v2, %v1772_v2  ;;  %v1790_v20 = vpack.c.bf16 %v1774_v4, %v1774_v4 }
 0x7bd   : > { %v1789_v15 = vpack.c.bf16 %v1773_v7, %v1773_v7  ;;  %v1791_v16 = vpack.c.bf16 %v1775_v8, %v1775_v8 }
 0x7bf   : > { %v1560_v22 = vpop.f32.mrb[24].mxu0  ;;  %v1601_v24 = vpop.f32.mrb[24].mxu1  ;;  %2035 = vmatprep.mubr.bf16.mxu0 %v1789_v15  ;;  %2075 = vmatprep.mubr.bf16.mxu1 %v1791_v16  ;;  %v1825_v15 = vld [vmem:[%s5837_s9 + $0xa8] sm:$0xff] }
 0x7c0   : > { %v1562_v25 = vpop.f32.mrb[25].mxu0  ;;  %v1603_v26 = vpop.f32.mrb[25].mxu1  ;;  %2036 = vmatmul.mubr.bf16.vlgmr.msra.gmra.mrb[36].mxu0 %v1788_v19  ;;  %2076 = vmatmul.mubr.bf16.vlgmr.msra.gmra.mrb[36].mxu1 %v1790_v20  ;;  %v1561_v53 = vadd.f32 %v1560_v22, %v1220_v31  ;;  %v1602_v54 = vadd.f32 %v1601_v24, %v1228_v32  ;;  %v1833_v16 = vld [vmem:[%s5837_s9 + $0xe8] sm:$0xff]  ;;  %v1236_v31 = vrot.slane %v5320_v35, %v5268_v44 }
 0x7c1   : > { %v1563_v27 = vadd.f32 %v1562_v25, %v1224_v17  ;;  %v1604_v28 = vadd.f32 %v1603_v26, %v1232_v18  ;;  %2084 = vmatpush1.bf16.xpose.msra.mxu0 %v4389_v38  ;;  %2124 = vmatpush1.bf16.xpose.msra.mxu1 %v4391_v39  ;;  %v1564_v29 = vpop.f32.mrb[26].mxu0  ;;  %v1605_v30 = vpop.f32.mrb[26].mxu1  ;;  %v1816_v39 = vld [vmem:[%s5837_s9 + $0x60] sm:$0xff]  ;;  %v4410_v25 = vcombine.high %v1824_v11, %v1832_v12 }
 0x7c2   : > { %v1565_v33 = vpop.f32.mrb[27].mxu0  ;;  %v1606_v34 = vpop.f32.mrb[27].mxu1  ;;  %2085 = vmatprep.subr.bf16.mxu0 %v4406_v21  ;;  %2125 = vmatprep.subr.bf16.mxu1 %v4408_v10  ;;  %v4394_v55 = vcombine.high %v1808_v36, %v1816_v39  ;;  %v1776_v5 = vmax.f32 %v1561_v53, 0.0  ;;  %v1778_v6 = vmax.f32 %v1602_v54, 0.0  ;;  %v4393_v18 = vcombine.low %v1808_v36, %v1816_v39  ;;  %v1810_v36 = vld [vmem:[%s5837_s9 + $0x30] sm:$0xff]  ;;  %v1811_v39 = vld [vmem:[%s5837_s9 + $0x38] sm:$0xff] }
 0x7c3   : > { %v1777_v37 = vmax.f32 %v1563_v27, 0.0  ;;  %v1779_v38 = vmax.f32 %v1604_v28, 0.0  ;;  %v4395_v10 = vcombine.low %v1809_v40, %v1817_v42  ;;  %v4412_v26 = vcombine.high %v1825_v15, %v1833_v16  ;;  %v1819_v40 = vld [vmem:[%s5837_s9 + $0x78] sm:$0xff] }
 0x7c4   : > { %v1792_v19 = vpack.c.bf16 %v1776_v5, %v1776_v5  ;;  %v1794_v20 = vpack.c.bf16 %v1778_v6, %v1778_v6  ;;  %v1244_v34 = vrot.slane %v5320_v35, %v5270_v45  ;;  %v1264_v42 = vrot.slane %v5320_v35, %v5291_v0 }
 0x7c5   : > { %v1793_v49 = vpack.c.bf16 %v1777_v37, %v1777_v37  ;;  %v1795_v50 = vpack.c.bf16 %v1779_v38, %v1779_v38  ;;  %v1818_v37 = vld [vmem:[%s5837_s9 + $0x70] sm:$0xff]  ;;  %v1256_v38 = vrot.slane %v5320_v35, %v5289_v63  ;;  %v4399_v5 = vcombine.low %v1811_v39, %v1819_v40 }
 0x7c7   : > { %v1642_v57 = vpop.f32.mrb[28].mxu0  ;;  %v1683_v58 = vpop.f32.mrb[28].mxu1  ;;  %2115 = vmatprep.mubr.bf16.mxu0 %v1793_v49  ;;  %2155 = vmatprep.mubr.bf16.mxu1 %v1795_v50  ;;  %v4411_v49 = vcombine.low %v1825_v15, %v1833_v16  ;;  %v4398_v50 = vcombine.high %v1810_v36, %v1818_v37 }
 0x7c8   : > { %v1644_v59 = vpop.f32.mrb[29].mxu0  ;;  %v1685_v60 = vpop.f32.mrb[29].mxu1 }
 0x7c9   : > { %v1645_v61 = vadd.f32 %v1644_v59, %v1240_v51  ;;  %v1686_v62 = vadd.f32 %v1685_v60, %v1248_v52  ;;  %2086 = vmatpush1.bf16.xpose.msra.mxu0 %v4405_v43  ;;  %2126 = vmatpush1.bf16.xpose.msra.mxu1 %v4407_v46  ;;  %v1646_v2 = vpop.f32.mrb[30].mxu0  ;;  %v1687_v4 = vpop.f32.mrb[30].mxu1  ;;  %v4409_v43 = vcombine.low %v1824_v11, %v1832_v12  ;;  %v1826_v60 = vld [vmem:[%s5837_s9 + $0xb0] sm:$0xff] }
 0x7ca   : > { %v1647_v3 = vpop.f32.mrb[31].mxu0  ;;  %v1688_v7 = vpop.f32.mrb[31].mxu1  ;;  %2163 = vmatprep.subr.bf16.mxu0 %v4394_v55  ;;  %2203 = vmatprep.subr.bf16.mxu1 %v4396_v56  ;;  %v1643_v46 = vadd.f32 %v1642_v57, %v1236_v31  ;;  %v1684_v51 = vadd.f32 %v1683_v58, %v1244_v34  ;;  %v4400_v52 = vcombine.high %v1811_v39, %v1819_v40  ;;  %v1834_v57 = vld [vmem:[%s5837_s9 + $0xf0] sm:$0xff]  ;;  %v1835_v2 = vld [vmem:[%s5837_s9 + $0xf8] sm:$0xff] }
 0x7cb   : > { %v1781_v8 = vmax.f32 %v1645_v61, 0.0  ;;  %v1783_v9 = vmax.f32 %v1686_v62, 0.0  ;;  %v4397_v58 = vcombine.low %v1810_v36, %v1818_v37  ;;  %v1827_v62 = vld [vmem:[%s5837_s9 + $0xb8] sm:$0xff]  ;;  %v4414_v3 = vcombine.high %v1826_v60, %v1834_v57 }
 0x7cc   : > { %v1780_v55 = vmax.f32 %v1643_v46, 0.0  ;;  %v1782_v56 = vmax.f32 %v1684_v51, 0.0  ;;  %v1252_v11 = vrot.slane %v5320_v35, %v5305_v13  ;;  %v1260_v12 = vrot.slane %v5320_v35, %v5307_v14  ;;  %v4384_v35 = vld [vmem:[%s5838_s10] ss:$0 sm:$0xff] }
 0x7cd   : > { %v1797_v17 = vpack.c.bf16 %v1781_v8, %v1781_v8  ;;  %v1799_v21 = vpack.c.bf16 %v1783_v9, %v1783_v9  ;;  %v4416_v8 = vcombine.high %v1827_v62, %v1835_v2  ;;  %v4413_v15 = vcombine.low %v1826_v60, %v1834_v57 }
 0x7ce   : > { %v1796_v4 = vpack.c.bf16 %v1780_v55, %v1780_v55  ;;  %v1798_v6 = vpack.c.bf16 %v1782_v56, %v1782_v56 }
 0x7cf   : > { %v5350_v22 = vpop.f32.mrb[32].mxu0  ;;  %v5352_v24 = vpop.f32.mrb[32].mxu1 }
 0x7d0   : > { %2116 = vmatmul.mubr.bf16.vlgmr.msra.gmra.mrb[40].mxu0 %v1792_v19  ;;  %2156 = vmatmul.mubr.bf16.vlgmr.msra.gmra.mrb[40].mxu1 %v1794_v20  ;;  %v1726_v27 = vpop.f32.mrb[33].mxu0  ;;  %v1767_v28 = vpop.f32.mrb[33].mxu1  ;;  %v1725_v16 = vadd.f32 %v5350_v22, %v1252_v11 }
 0x7d1   : > { %2164 = vmatpush1.bf16.xpose.msra.mxu0 %v4393_v18  ;;  %2195 = vmatprep.mubr.bf16.mxu0 %v1797_v17  ;;  %v1728_v29 = vpop.f32.mrb[34].mxu0  ;;  %v1769_v30 = vpop.f32.mrb[34].mxu1  ;;  %v1727_v53 = vadd.f32 %v1726_v27, %v1256_v38  ;;  %v1768_v54 = vadd.f32 %v1767_v28, %v1264_v42  ;;  %v4415_v17 = vcombine.low %v1827_v62, %v1835_v2 }
 0x7d2   : > { %2204 = vmatpush1.bf16.xpose.msra.mxu1 %v4395_v10  ;;  %2235 = vmatprep.mubr.bf16.mxu1 %v1799_v21  ;;  %v1729_v32 = vpop.f32.mrb[35].mxu0  ;;  %v1770_v33 = vpop.f32.mrb[35].mxu1  ;;  %v1766_v18 = vadd.f32 %v5352_v24, %v1260_v12  ;;  %v1784_v19 = vmax.f32 %v1725_v16, 0.0 }
 0x7d3   : > { %2165 = vmatprep.subr.bf16.mxu0 %v4410_v25  ;;  %2205 = vmatprep.subr.bf16.mxu1 %v4412_v26  ;;  %v1785_v59 = vmax.f32 %v1727_v53, 0.0  ;;  %v1787_v61 = vmax.f32 %v1768_v54, 0.0 }
 0x7d4   : > { %v1786_v20 = vmax.f32 %v1766_v18, 0.0  ;;  %v1800_v21 = vpack.c.bf16 %v1784_v19, %v1784_v19  ;;  %v4808_v18 = vld [vmem:[%s5829_s1 + $0x10] sm:$0xff]   ;;  %v4809_v19 = vld [vmem:[%s5829_s1 + $0x18] sm:$0xff]  }
 0x7d5   : > { %v1801_v7 = vpack.c.bf16 %v1785_v59, %v1785_v59  ;;  %v1803_v9 = vpack.c.bf16 %v1787_v61, %v1787_v61 }
 0x7d6   : > { %v1802_v10 = vpack.c.bf16 %v1786_v20, %v1786_v20 }
 0x7d9   : > { %2166 = vmatpush1.bf16.xpose.msra.mxu0 %v4409_v43 }
 0x7da   : > { %2206 = vmatpush1.bf16.xpose.msra.mxu1 %v4411_v49  ;;  %2243 = vmatprep.subr.bf16.mxu0 %v4398_v50 }
 0x7db   : > { %2283 = vmatprep.subr.bf16.mxu1 %v4400_v52 }
 0x7e0   : > { %2196 = vmatmul.mubr.bf16.vlgmr.msra.gmra.mrb[44].mxu0 %v1796_v4 }
 0x7e1   : > { %2236 = vmatmul.mubr.bf16.vlgmr.msra.gmra.mrb[44].mxu1 %v1798_v6  ;;  %2244 = vmatpush1.bf16.xpose.msra.mxu0 %v4397_v58 }
 0x7e2   : > { %2275 = vmatprep.mubr.bf16.mxu0 %v1801_v7  ;;  %2284 = vmatpush1.bf16.xpose.msra.mxu1 %v4399_v5 }
 0x7e3   : > { %2315 = vmatprep.mubr.bf16.mxu1 %v1803_v9  ;;  %2245 = vmatprep.subr.bf16.mxu0 %v4414_v3 }
 0x7e4   : > { %2285 = vmatprep.subr.bf16.mxu1 %v4416_v8 }
 0x7e9   : > { %2246 = vmatpush1.bf16.xpose.msra.mxu0 %v4413_v15 }
 0x7ea   : > { %2286 = vmatpush1.bf16.xpose.msra.mxu1 %v4415_v17  ;;  %4707 = vmatprep.subr.bf16.mxu0 %v4864_v1 }
 0x7eb   : > { %4715 = vmatprep.subr.bf16.mxu1 %v4864_v1 }
 0x7f0   : > { %2276 = vmatmul.mubr.bf16.vlgmr.msra.gmra.mrb[48].mxu0 %v1800_v21 }
 0x7f1   : > { %2316 = vmatmul.mubr.bf16.vlgmr.msra.gmra.mrb[48].mxu1 %v1802_v10  ;;  %4711 = vmatprep.mubr.msk.bf16.mxu0 %vm4865_vm0, %v4864_v1 }
 0x7f2   : > { %4717 = vmatprep.mubr.msk.bf16.mxu1 %vm4865_vm0, %v4864_v1  ;;  %4708 = vmatpush3.bf16.msra.mxu0 %v4808_v18 }
 0x7f3   : > { %4709 = vmatprep.subr.bf16.mxu0 %v4864_v1 }
 0x7f6   : > { %4710 = vmatpush3.bf16.msra.mxu0 %v4809_v19 }
 0x7f7   : > { %4721 = vmatprep.subr.bf16.mxu0 %v4864_v1 }
 0x893   : > { %v2037_v22 = vpop.f32.mrb[36].mxu0  ;;  %v2077_v24 = vpop.f32.mrb[36].mxu1 }
 0x894   : > { %v2038_v25 = vadd.f32 %v4384_v35, %v2037_v22  ;;  %v2039_v26 = vpop.f32.mrb[37].mxu0  ;;  %v2079_v27 = vpop.f32.mrb[37].mxu1  ;;  %v4417_v35 = vld [vmem:[%s5839_s11] ss:$0 sm:$0xff] }
 0x895   : > { %v2040_v28 = vpop.f32.mrb[38].mxu0  ;;  %v2080_v29 = vpop.f32.mrb[38].mxu1 }
 0x896   : > { %v2078_v30 = vadd.f32 %v2077_v24, %v2038_v25  ;;  %v2041_v31 = vpop.f32.mrb[39].mxu0  ;;  %v2081_v32 = vpop.f32.mrb[39].mxu1  ;;  %v4418_v24 = vld [vmem:[%s5840_s12] ss:$0 sm:$0xff]  ;;  %v4424_v28 = vld [vmem:[%s5830_s2 + $0x1] ss:$0 sm:$0xff] }
 0x8a3   : > { %v2117_v33 = vpop.f32.mrb[40].mxu0  ;;  %v2157_v34 = vpop.f32.mrb[40].mxu1 }
 0x8a4   : > { %v2118_v36 = vadd.f32 %v2117_v33, %v2078_v30  ;;  %v2119_v37 = vpop.f32.mrb[41].mxu0  ;;  %v2159_v38 = vpop.f32.mrb[41].mxu1 }
 0x8a5   : > { %v2120_v39 = vpop.f32.mrb[42].mxu0  ;;  %v2160_v40 = vpop.f32.mrb[42].mxu1 }
 0x8a6   : > { %v2158_v42 = vadd.f32 %v2157_v34, %v2118_v36  ;;  %v2121_v43 = vpop.f32.mrb[43].mxu0  ;;  %v2161_v46 = vpop.f32.mrb[43].mxu1 }
 0x8b3   : > { %v2197_v49 = vpop.f32.mrb[44].mxu0 }
 0x8b4   : > { %v2198_v50 = vadd.f32 %v2197_v49, %v2158_v42  ;;  %v2237_v51 = vpop.f32.mrb[44].mxu1  ;;  %v2199_v52 = vpop.f32.mrb[45].mxu0 }
 0x8b5   : > { %v2239_v53 = vpop.f32.mrb[45].mxu1  ;;  %v2200_v54 = vpop.f32.mrb[46].mxu0 }
 0x8b6   : > { %v2238_v55 = vadd.f32 %v2237_v51, %v2198_v50  ;;  %v2240_v56 = vpop.f32.mrb[46].mxu1  ;;  %v2201_v59 = vpop.f32.mrb[47].mxu0 }
 0x8b7   : > { %v2241_v60 = vpop.f32.mrb[47].mxu1 }
 0x8c3   : > { %v2277_v57 = vpop.f32.mrb[48].mxu0 }
 0x8c4   : > { %v2278_v61 = vadd.f32 %v2277_v57, %v2238_v55  ;;  %v2317_v58 = vpop.f32.mrb[48].mxu1  ;;  %v2279_v62 = vpop.f32.mrb[49].mxu0 }
 0x8c5   : > { %v2319_v2 = vpop.f32.mrb[49].mxu1  ;;  %v2280_v4 = vpop.f32.mrb[50].mxu0 }
 0x8c6   : > { %v2318_v5 = vadd.f32 %v2317_v58, %v2278_v61  ;;  %v2320_v6 = vpop.f32.mrb[50].mxu1  ;;  %v2281_v3 = vpop.f32.mrb[51].mxu0 }
 0x8c7   : > { %v2321_v7 = vpop.f32.mrb[51].mxu1 }
 0x8c8   : > { %v2323_v8 = vadd.f32 %v2318_v5, %v5152_v41 }
 0x8ca   : > { %v2326_v9 = vsel %vm557_vm1, %v2323_v8, 0.0 }
 0x8cb   : > { %2327 = vadd.xlane.f32.xlu0 %v2326_v9 }
 0x958   : > { %v2328_v11 = vpop.xlane.xlu0 %2327 }
 0x959   : > { %v2329_v12 = vmul.f32 0.03125, %v2328_v11 }
 0x95b   : > { %v2330_v15 = vsub.f32 %v2323_v8, %v2329_v12 }
 0x95d   : > { %v2331_v16 = vmul.f32 %v2330_v15, %v2330_v15 }
 0x95f   : > { %v2332_v17 = vsel %vm557_vm1, %v2331_v16, 0.0 }
 0x960   : > { %2333 = vadd.xlane.f32.xlu0 %v2332_v17 }
 0x9ed   : > { %v2334_v41 = vpop.xlane.xlu0 %2333 }
 0x9ee   : > { %v2335_v20 = vmul.f32 0.03125, %v2334_v41 }
 0x9f0   : > { %v2336_v21 = vadd.f32 1e-05, %v2335_v20 }
 0x9f2   : > { %4830 = vrsqrt.f32 %v2336_v21 }
 0x9fc   : > { %v4831_v10 = vpop.eup %4830 }
 0x9fd   : > { %v2338_v22 = vmul.f32 %v4831_v10, %v2330_v15 }
 0x9ff   : > { %v2345_v25 = vmul.f32 %v4417_v35, %v2338_v22 }
 0xa01   : > { %v5418_v26 = vadd.f32 %v4418_v24, %v2345_v25 }
 0xa03   : > { %v2353_v27 = vpack.c.bf16 %v5418_v26, %v5418_v26 }
 0xa05   : > { %4712 = vmatmul.mubr.msk.bf16.vlgmr.msra.gmra.mrb[52].mxu0 %vm557_vm1, %v2353_v27 }
 0xa06   : > { %4723 = vmatprep.mubr.msk.bf16.mxu0 %vm4865_vm0, %v4864_v1 }
 0xad8   : > { %v2416_v29 = vpop.f32.mrb[52].mxu0 }
 0xad9   : > { %v2417_v30 = vadd.f32 %v4424_v28, %v2416_v29  ;;  %v4713_v31 = vpop.f32.mrb[53].mxu0 }
 0xada   : > { %v2419_v32 = vpop.f32.mrb[54].mxu0 }
 0xadb   : > { %v5428_v33 = vpack.c.bf16 %v2417_v30, %v2417_v30  ;;  %v4714_v34 = vpop.f32.mrb[55].mxu0 }
 0xadd   : > { %2474 = vrot.lane.b32.xlu0 %v5428_v33, %s4869_s24  ;;  %2424 = vrot.lane.b32.xlu1 %v5428_v33, %s4867_s20  ;;  %s5862_s20 = smov 56   ;;  %s5863_s24 = smov 64  }
 0xae1   : > { %2574 = vrot.lane.b32.xlu0 %v5428_v33, %s4871_s26  ;;  %2472 = vrot.lane.b32.xlu1 %v5428_v33, %s5858_s28  ;;  %s5864_s26 = smov 48   ;;  %s5867_s28 = smov 16  }
 0xae5   : > { %2572 = vrot.lane.b32.xlu0 %v5428_v33, %s5859_s29  ;;  %2524 = vrot.lane.b32.xlu1 %v5428_v33, %s5860_s19  ;;  %s5868_s29 = smov 24  }
 0xae9   : > { %2522 = vrot.lane.b32.xlu1 %v5428_v33, %s5861_s27 }
 0xb4f   : > { %v2475_v36 = vpop.permute.xlu0 %2474  ;;  %v2425_v37 = vpop.permute.xlu1 %2424 }
 0xb50   : > { %v2480_v38 = vsel %vm605_vm2, %v2475_v36, 0  ;;  %v2430_v39 = vsel %vm605_vm2, %v2425_v37, 0 }
 0xb51   : > { %4716 = vmatpush3.bf16.xpose.msra.mxu1 %v2430_v39  ;;  %4722 = vmatpush3.bf16.xpose.msra.mxu0 %v2480_v38 }
 0xb52   : > { %4727 = vmatprep.subr.bf16.mxu1 %v4864_v1  ;;  %4733 = vmatprep.subr.bf16.mxu0 %v4864_v1 }
 0xb53   : > { %v2473_v40 = vpop.permute.xlu1 %2472  ;;  %v2575_v42 = vpop.permute.xlu0 %2574 }
 0xb54   : > { %v2580_v46 = vsel %vm605_vm2, %v2575_v42, 0 }
 0xb57   : > { %v2525_v43 = vpop.permute.xlu1 %2524  ;;  %v2573_v50 = vpop.permute.xlu0 %2572 }
 0xb58   : > { %v2530_v49 = vsel %vm605_vm2, %v2525_v43, 0  ;;  %4718 = vmatmul.mubr.msk.bf16.vlgmr.msra.gmra.mrb[52].mxu1 %vm605_vm2, %v5428_v33  ;;  %4724 = vmatmul.mubr.msk.bf16.vlgmr.msra.gmra.mrb[56].mxu0 %vm605_vm2, %v2473_v40 }
 0xb59   : > { %4728 = vmatpush3.bf16.xpose.msra.mxu1 %v2530_v49  ;;  %4734 = vmatpush3.bf16.xpose.msra.mxu0 %v2580_v46 }
 0xb5a   : > { %4729 = vmatprep.mubr.msk.bf16.mxu1 %vm4865_vm0, %v4864_v1  ;;  %4735 = vmatprep.mubr.msk.bf16.mxu0 %vm4865_vm0, %v4864_v1 }
 0xb5b   : > { %4739 = vmatprep.subr.bf16.mxu1 %v4864_v1  ;;  %4745 = vmatprep.subr.bf16.mxu0 %v4864_v1  ;;  %v2523_v51 = vpop.permute.xlu1 %2522 }
 0xb60   : > { %4730 = vmatmul.mubr.msk.bf16.vlgmr.msra.gmra.mrb[56].mxu1 %vm605_vm2, %v2523_v51  ;;  %4736 = vmatmul.mubr.msk.bf16.vlgmr.msra.gmra.mrb[60].mxu0 %vm605_vm2, %v2573_v50 }
 0xb61   : > { %4741 = vmatprep.mubr.msk.bf16.mxu1 %vm4865_vm0, %v4864_v1  ;;  %4747 = vmatprep.mubr.msk.bf16.mxu0 %vm4865_vm0, %v4864_v1 }
 0xc2b   : > { %v2466_v52 = vpop.f32.mrb[52].mxu1  ;;  %v2516_v53 = vpop.f32.mrb[56].mxu0 }
 0xc2c   : > { %v2622_v54 = vmul.f32 0.35355338, %v2466_v52  ;;  %v2623_v55 = vmul.f32 0.35355338, %v2516_v53  ;;  %v4719_v56 = vpop.f32.mrb[53].mxu1  ;;  %v4725_v59 = vpop.f32.mrb[57].mxu0 }
 0xc2d   : > { %v2469_v60 = vpop.f32.mrb[54].mxu1  ;;  %v2519_v57 = vpop.f32.mrb[58].mxu0 }
 0xc2e   : > { %v4720_v61 = vpop.f32.mrb[55].mxu1  ;;  %v4726_v58 = vpop.f32.mrb[59].mxu0  ;;  %v2626_v62 = vsel %vm605_vm2, %v2622_v54, -inf  ;;  %v2629_v2 = vsel %vm605_vm2, %v2623_v55, -inf }
 0xc2f   : > { %2627 = vmax.xlane.f32.xlu1 %v2626_v62  ;;  %2630 = vmax.xlane.f32.xlu0 %v2629_v2 }
 0xc33   : > { %v2566_v4 = vpop.f32.mrb[56].mxu1  ;;  %v2616_v5 = vpop.f32.mrb[60].mxu0 }
 0xc34   : > { %v2624_v6 = vmul.f32 0.35355338, %v2566_v4  ;;  %v2625_v3 = vmul.f32 0.35355338, %v2616_v5  ;;  %v4731_v7 = vpop.f32.mrb[57].mxu1  ;;  %v4737_v8 = vpop.f32.mrb[61].mxu0 }
 0xc35   : > { %v2569_v9 = vpop.f32.mrb[58].mxu1  ;;  %v2619_v11 = vpop.f32.mrb[62].mxu0  ;;  %v4811_v7 = vld [vmem:[%s5831_s3 + $0x18] sm:$0xff]  }
 0xc36   : > { %v4732_v12 = vpop.f32.mrb[59].mxu1  ;;  %v4738_v15 = vpop.f32.mrb[63].mxu0  ;;  %v2632_v16 = vsel %vm605_vm2, %v2624_v6, -inf  ;;  %v2635_v17 = vsel %vm605_vm2, %v2625_v3, -inf }
 0xc37   : > { %2633 = vmax.xlane.f32.xlu0 %v2632_v16  ;;  %2636 = vmax.xlane.f32.xlu1 %v2635_v17 }
 0xc48   : > { %2722 = vrot.lane.b32.xlu1 %v5428_v33, %s5862_s20 }
 0xc4d   : > { %2672 = vrot.lane.b32.xlu0 %v5428_v33, %s5863_s24 }
 0xcbc   : > { %v2628_v18 = vpop.xlane.xlu1 %2627  ;;  %v2631_v19 = vpop.xlane.xlu0 %2630 }
 0xcbd   : > { %v2638_v41 = vsub.f32 %v2622_v54, %v2628_v18  ;;  %v2639_v20 = vsub.f32 %v2623_v55, %v2631_v19 }
 0xcbf   : > { %v2642_v21 = vmul.f32 1.442695, %v2638_v41  ;;  %v2644_v10 = vmul.f32 1.442695, %v2639_v20 }
 0xcc1   : > { %4832 = vpow2.f32 %v2642_v21 }
 0xcc2   : > { %4834 = vpow2.f32 %v2644_v10 }
 0xcc4   : > { %v2634_v35 = vpop.xlane.xlu0 %2633  ;;  %v2637_v22 = vpop.xlane.xlu1 %2636 }
 0xcc5   : > { %v2640_v24 = vsub.f32 %v2624_v6, %v2634_v35  ;;  %v2641_v25 = vsub.f32 %v2625_v3, %v2637_v22  ;;  %v4810_v3 = vld [vmem:[%s5831_s3 + $0x10] sm:$0xff]  }
 0xcc7   : > { %v2646_v27 = vmul.f32 1.442695, %v2640_v24  ;;  %v2648_v28 = vmul.f32 1.442695, %v2641_v25 }
 0xcc8   : > { %v2673_v29 = vpop.permute.xlu0 %2672  ;;  %v2723_v30 = vpop.permute.xlu1 %2722 }
 0xcc9   : > { %4836 = vpow2.f32 %v2646_v27  ;;  %v2678_v31 = vsel %vm857_vm3, %v2673_v29, 0  ;;  %v2728_v32 = vsel %vm857_vm3, %v2723_v30, 0 }
 0xcca   : > { %4838 = vpow2.f32 %v2648_v28  ;;  %4740 = vmatpush3.bf16.msra.mxu1 %v2678_v31  ;;  %4746 = vmatpush3.bf16.msra.mxu0 %v2728_v32 }
 0xccb   : > { %v4833_v34 = vpop.eup %4832  ;;  %4751 = vmatprep.subr.bf16.mxu1 %v4864_v1  ;;  %4757 = vmatprep.subr.bf16.mxu0 %v4864_v1 }
 0xccc   : > { %v4835_v36 = vpop.eup %4834  ;;  %v2650_v37 = vsel %vm605_vm2, %v4833_v34, 0.0 }
 0xccd   : > { %2651 = vadd.xlane.f32.xlu0 %v2650_v37  ;;  %v2653_v38 = vsel %vm605_vm2, %v4835_v36, 0.0 }
 0xcce   : > { %2654 = vadd.xlane.f32.xlu1 %v2653_v38 }
 0xcd3   : > { %v4837_v39 = vpop.eup %4836 }
 0xcd4   : > { %v4839_v40 = vpop.eup %4838  ;;  %v2656_v42 = vsel %vm605_vm2, %v4837_v39, 0.0 }
 0xcd5   : > { %2657 = vadd.xlane.f32.xlu0 %v2656_v42  ;;  %v2659_v43 = vsel %vm605_vm2, %v4839_v40, 0.0 }
 0xcd6   : > { %2660 = vadd.xlane.f32.xlu1 %v2659_v43 }
 0xce7   : > { %2770 = vrot.lane.b32.xlu1 %v5428_v33, %s5864_s26 }
 0xceb   : > { %2820 = vrot.lane.b32.xlu0 %v5428_v33, %s5865_s23 }
 0xd5a   : > { %v2652_v46 = vpop.xlane.xlu0 %2651 }
 0xd5b   : > { %4840 = vrcp.f32 %v2652_v46  ;;  %v2655_v49 = vpop.xlane.xlu1 %2654 }
 0xd5c   : > { %4842 = vrcp.f32 %v2655_v49 }
 0xd62   : > { %v2658_v50 = vpop.xlane.xlu0 %2657 }
 0xd63   : > { %4844 = vrcp.f32 %v2658_v50  ;;  %v2661_v51 = vpop.xlane.xlu1 %2660 }
 0xd64   : > { %4846 = vrcp.f32 %v2661_v51 }
 0xd65   : > { %v4841_v52 = vpop.eup %4840 }
 0xd66   : > { %v4843_v53 = vpop.eup %4842  ;;  %v2663_v54 = vmul.f32 %v4841_v52, %v4833_v34  ;;  %v2821_v60 = vpop.permute.xlu0 %2820  ;;  %v4441_v34 = vld [vmem:[%s5832_s4 + $0x1] ss:$0 sm:$0xff] }
 0xd67   : > { %v2665_v55 = vmul.f32 %v4843_v53, %v4835_v36  ;;  %v2771_v56 = vpop.permute.xlu1 %2770  ;;  %v2826_v58 = vsel %vm857_vm3, %v2821_v60, 0  ;;  %v4449_v53 = vld [vmem:[%s5835_s7 + $0x100] sm:$0xff] }
 0xd68   : > { %v2776_v57 = vsel %vm857_vm3, %v2771_v56, 0  ;;  %v4458_v56 = vld [vmem:[%s5835_s7 + $0x148] sm:$0xff] }
 0xd69   : > { %v2670_v59 = vpack.c.bf16 %v2665_v55, %v2663_v54  ;;  %v4457_v54 = vld [vmem:[%s5835_s7 + $0x140] sm:$0xff] }
 0xd6a   : > { %v4484_v55 = vcombine.high %v4449_v53, %v4457_v54 }
 0xd6b   : > { %4742 = vmatmul.mubr.msk.bf16.vlgmr.msra.gmra.mrb[60].mxu1 %vm605_vm2, %v2670_v59  ;;  %v2721_v33 = vrot.slane %v2670_v59, 4  ;;  %v4483_v59 = vcombine.low %v4449_v53, %v4457_v54 }
 0xd6c   : > { %4752 = vmatpush3.bf16.msra.mxu1 %v2776_v57  ;;  %4753 = vmatprep.mubr.msk.bf16.mxu1 %vm4865_vm0, %v4864_v1 }
 0xd6d   : > { %v4845_v61 = vpop.eup %4844  ;;  %4748 = vmatmul.mubr.msk.bf16.vlgmr.msra.gmra.mrb[64].mxu0 %vm605_vm2, %v2721_v33  ;;  %4763 = vmatprep.subr.bf16.mxu1 %v4864_v1  ;;  %v4465_v33 = vld [vmem:[%s5835_s7 + $0x180] sm:$0xff] }
 0xd6e   : > { %v4847_v62 = vpop.eup %4846  ;;  %v2667_v2 = vmul.f32 %v4845_v61, %v4837_v39  ;;  %4758 = vmatpush3.bf16.msra.mxu0 %v2826_v58  ;;  %4759 = vmatprep.mubr.msk.bf16.mxu0 %vm4865_vm0, %v4864_v1  ;;  %v4473_v61 = vld [vmem:[%s5835_s7 + $0x1c0] sm:$0xff]  ;;  %v4466_v58 = vld [vmem:[%s5835_s7 + $0x188] sm:$0xff] }
 0xd6f   : > { %v2669_v4 = vmul.f32 %v4847_v62, %v4839_v40  ;;  %3266 = vmatprep.subr.bf16.mxu0 %v4484_v55  ;;  %v4500_v62 = vcombine.high %v4465_v33, %v4473_v61  ;;  %v4463_v55 = vld [vmem:[%s5835_s7 + $0x170] sm:$0xff] }
 0xd71   : > { %v2671_v5 = vpack.c.bf16 %v2669_v4, %v2667_v2  ;;  %v4474_v2 = vld [vmem:[%s5835_s7 + $0x1c8] sm:$0xff]  ;;  %v4499_v4 = vcombine.low %v4465_v33, %v4473_v61 }
 0xd73   : > { %4754 = vmatmul.mubr.msk.bf16.vlgmr.msra.gmra.mrb[64].mxu1 %vm605_vm2, %v2671_v5  ;;  %v2819_v6 = vrot.slane %v2671_v5, 4  ;;  %v4501_v5 = vcombine.low %v4466_v58, %v4474_v2 }
 0xd74   : > { %4767 = vmatprep.mubr.msk.bf16.mxu1 %vm4865_vm0, %v4864_v1  ;;  %4764 = vmatpush3.bf16.msra.mxu1 %v4810_v3  ;;  %v4451_v3 = vld [vmem:[%s5835_s7 + $0x110] sm:$0xff] }
 0xd75   : > { %4760 = vmatmul.mubr.msk.bf16.vlgmr.msra.gmra.mrb[68].mxu0 %vm605_vm2, %v2819_v6  ;;  %4765 = vmatprep.subr.bf16.mxu1 %v4864_v1  ;;  %v4502_v6 = vcombine.high %v4466_v58, %v4474_v2  ;;  %v4471_v58 = vld [vmem:[%s5835_s7 + $0x1b0] sm:$0xff]  ;;  %v4472_v2 = vld [vmem:[%s5835_s7 + $0x1b8] sm:$0xff] }
 0xd76   : > { %3298 = vmatprep.mubr.bf16.mxu0 %v4880_v23  ;;  %3267 = vmatpush1.bf16.msra.mxu0 %v4483_v59  ;;  %v4464_v59 = vld [vmem:[%s5835_s7 + $0x178] sm:$0xff] }
 0xd77   : > { %3268 = vmatprep.subr.bf16.mxu0 %v4500_v62  ;;  %v4479_v62 = vld [vmem:[%s5835_s7 + $0x1f0] sm:$0xff] }
 0xd78   : > { %4766 = vmatpush3.bf16.msra.mxu1 %v4811_v7  ;;  %v4459_v7 = vld [vmem:[%s5835_s7 + $0x150] sm:$0xff] }
 0xd7a   : > { %3269 = vmatpush1.bf16.msra.mxu0 %v4499_v4  ;;  %v4480_v4 = vld [vmem:[%s5835_s7 + $0x1f8] sm:$0xff] }
 0xe3e   : > { %v2714_v8 = vpop.f32.mrb[60].mxu1 }
 0xe3f   : > { %v4743_v9 = vpop.f32.mrb[61].mxu1 }
 0xe40   : > { %v2717_v11 = vpop.f32.mrb[62].mxu1  ;;  %v2764_v12 = vpop.f32.mrb[64].mxu0  ;;  %v4488_v9 = vcombine.high %v4451_v3, %v4459_v7 }
 0xe41   : > { %v4744_v15 = vpop.f32.mrb[63].mxu1  ;;  %2869 = vrot.lane.b32.xlu1 %v2764_v12, %s5866_s18  ;;  %v4749_v16 = vpop.f32.mrb[65].mxu0  ;;  %v4460_v11 = vld [vmem:[%s5835_s7 + $0x158] sm:$0xff]  ;;  %v4487_v12 = vcombine.low %v4451_v3, %v4459_v7  ;;  %v4512_v3 = vcombine.high %v4471_v58, %v4479_v62  ;;  %v4514_v7 = vcombine.high %v4472_v2, %v4480_v4 }
 0xe42   : > { %v2767_v17 = vpop.f32.mrb[66].mxu0  ;;  %3348 = vmatprep.subr.bf16.mxu0 %v4488_v9  ;;  %v4531_v9 = vld [vmem:[%s5837_s9 + $0x140] sm:$0xff] }
 0xe43   : > { %v4750_v18 = vpop.f32.mrb[67].mxu0 }
 0xe46   : > { %v2812_v19 = vpop.f32.mrb[64].mxu1 }
 0xe47   : > { %2873 = vrot.lane.b32.xlu0 %v2812_v19, %s5867_s28  ;;  %v4755_v41 = vpop.f32.mrb[65].mxu1  ;;  %s530_s28 = scalar_lea.vmem %s5844_s16, %s4325_s0 }
 0xe48   : > { %v2815_v20 = vpop.f32.mrb[66].mxu1  ;;  %v2862_v21 = vpop.f32.mrb[68].mxu0 }
 0xe49   : > { %v4756_v10 = vpop.f32.mrb[67].mxu1  ;;  %2877 = vrot.lane.b32.xlu1 %v2862_v21, %s5868_s29  ;;  %v4761_v35 = vpop.f32.mrb[69].mxu0  ;;  %v4447_v20 = vld [vmem:[%s5833_s5 + $0x1] ss:$0 sm:$0xff] }
 0xe4a   : > { %v2865_v22 = vpop.f32.mrb[70].mxu0  ;;  %v4448_v10 = vld [vmem:[%s5834_s6 + $0x1] ss:$0 sm:$0xff] }
 0xe4b   : > { %v4762_v24 = vpop.f32.mrb[71].mxu0  ;;  %v4467_v22 = vld [vmem:[%s5835_s7 + $0x190] sm:$0xff] }
 0xe4c   : > { %v4475_v24 = vld [vmem:[%s5835_s7 + $0x1d0] sm:$0xff] }
 0xeb3   : > { %v2870_v25 = vpop.permute.xlu1 %2869 }
 0xeb4   : > { %v2880_v27 = vsel %vm605_vm2, %v2714_v8, %v2870_v25  ;;  %v4452_v8 = vld [vmem:[%s5835_s7 + $0x118] sm:$0xff] }
 0xeb5   : > { %v4489_v15 = vcombine.low %v4452_v8, %v4460_v11  ;;  %v4490_v16 = vcombine.high %v4452_v8, %v4460_v11  ;;  %v4468_v25 = vld [vmem:[%s5835_s7 + $0x198] sm:$0xff]  ;;  %v4523_v8 = vld [vmem:[%s5837_s9 + $0x100] sm:$0xff]  ;;  %v4524_v11 = vld [vmem:[%s5837_s9 + $0x108] sm:$0xff] }
 0xeb9   : > { %v2874_v28 = vpop.permute.xlu0 %2873 }
 0xeba   : > { %v2881_v29 = vsel %vm1062_vm4, %v2880_v27, %v2874_v28  ;;  %v4476_v27 = vld [vmem:[%s5835_s7 + $0x1d8] sm:$0xff] }
 0xebb   : > { %v2878_v30 = vpop.permute.xlu1 %2877 }
 0xebc   : > { %v2882_v31 = vsel %vm1064_vm5, %v2881_v29, %v2878_v30  ;;  %v4504_v30 = vcombine.high %v4467_v22, %v4475_v24 }
 0xebd   : > { %v2883_v32 = vpack.c.bf16 %v2882_v31, %v2882_v31  ;;  %v4506_v31 = vcombine.high %v4468_v25, %v4476_v27 }
 0xebf   : > { %4768 = vmatmul.mubr.msk.bf16.vlgmr.msra.gmra.mrb[68].mxu1 %vm557_vm1, %v2883_v32  ;;  %v4453_v32 = vld [vmem:[%s5835_s7 + $0x120] sm:$0xff] }
 0xec0   : > { %3339 = vmatprep.mubr.bf16.mxu1 %v4880_v23 }
 0xf92   : > { %v2946_v36 = vpop.f32.mrb[68].mxu1 }
 0xf93   : > { %v2947_v37 = vadd.f32 %v4441_v34, %v2946_v36  ;;  %v4769_v38 = vpop.f32.mrb[69].mxu1  ;;  %v4461_v34 = vld [vmem:[%s5835_s7 + $0x160] sm:$0xff]  ;;  %v4454_v36 = vld [vmem:[%s5835_s7 + $0x128] sm:$0xff] }
 0xf94   : > { %v2949_v39 = vpop.f32.mrb[70].mxu1  ;;  %v4503_v38 = vcombine.low %v4467_v22, %v4475_v24 }
 0xf95   : > { %v4770_v40 = vpop.f32.mrb[71].mxu1  ;;  %v2952_v42 = vadd.f32 %v2947_v37, %v5418_v26  ;;  %v4450_v26 = vld [vmem:[%s5835_s7 + $0x108] sm:$0xff]  ;;  %v4505_v39 = vcombine.low %v4468_v25, %v4476_v27  ;;  %v4525_v27 = vld [vmem:[%s5837_s9 + $0x110] sm:$0xff] }
 0xf96   : > { %v4485_v60 = vcombine.low %v4450_v26, %v4458_v56  ;;  %v4486_v57 = vcombine.high %v4450_v26, %v4458_v56  ;;  %v4462_v37 = vld [vmem:[%s5835_s7 + $0x168] sm:$0xff]  ;;  %v4492_v40 = vcombine.high %v4453_v32, %v4461_v34  ;;  %v4455_v26 = vld [vmem:[%s5835_s7 + $0x130] sm:$0xff]  ;;  %v4456_v56 = vld [vmem:[%s5835_s7 + $0x138] sm:$0xff] }
 0xf97   : > { %v2957_v43 = vsel %vm557_vm1, %v2952_v42, 0.0  ;;  %v4496_v33 = vcombine.high %v4455_v26, %v4463_v55  ;;  %v4498_v61 = vcombine.high %v4456_v56, %v4464_v59 }
 0xf98   : > { %2958 = vadd.xlane.f32.xlu0 %v2957_v43  ;;  %3307 = vmatprep.subr.bf16.mxu1 %v4486_v57  ;;  %v4469_v43 = vld [vmem:[%s5835_s7 + $0x1a0] sm:$0xff] }
 0xf99   : > { %3308 = vmatpush1.bf16.msra.mxu1 %v4485_v60 }
 0xf9a   : > { %3309 = vmatprep.subr.bf16.mxu1 %v4502_v6  ;;  %v4497_v6 = vcombine.low %v4456_v56, %v4464_v59 }
 0xf9d   : > { %3310 = vmatpush1.bf16.msra.mxu1 %v4501_v5  ;;  %v4495_v5 = vcombine.low %v4455_v26, %v4463_v55 }
 0xf9e   : > { %3389 = vmatprep.subr.bf16.mxu1 %v4490_v16  ;;  %v4513_v16 = vcombine.low %v4472_v2, %v4480_v4  ;;  %v4549_v2 = vld [vmem:[%s5837_s9 + $0x1d0] sm:$0xff]  ;;  %v4542_v4 = vld [vmem:[%s5837_s9 + $0x198] sm:$0xff] }
0x1025   : > { %v2959_v46 = vpop.xlane.xlu0 %2958 }
0x1026   : > { %v2960_v49 = vmul.f32 0.03125, %v2959_v46  ;;  %v4477_v46 = vld [vmem:[%s5835_s7 + $0x1e0] sm:$0xff] }
0x1027   : > { %v4508_v53 = vcombine.high %v4469_v43, %v4477_v46  ;;  %v4507_v60 = vcombine.low %v4469_v43, %v4477_v46 }
0x1028   : > { %v2961_v50 = vsub.f32 %v2952_v42, %v2960_v49  ;;  %v4494_v42 = vcombine.high %v4454_v36, %v4462_v37  ;;  %v4470_v49 = vld [vmem:[%s5835_s7 + $0x1a8] sm:$0xff] }
0x102a   : > { %v2962_v51 = vmul.f32 %v2961_v50, %v2961_v50 }
0x102c   : > { %v2963_v52 = vsel %vm557_vm1, %v2962_v51, 0.0  ;;  %v4491_v51 = vcombine.low %v4453_v32, %v4461_v34  ;;  %v4534_v32 = vld [vmem:[%s5837_s9 + $0x158] sm:$0xff] }
0x102d   : > { %2964 = vadd.xlane.f32.xlu1 %v2963_v52  ;;  %v4493_v52 = vcombine.low %v4454_v36, %v4462_v37 }
0x10ba   : > { %v2965_v17 = vpop.xlane.xlu1 %2964 }
0x10bb   : > { %v2966_v18 = vmul.f32 0.03125, %v2965_v17  ;;  %v4558_v17 = vcombine.high %v4523_v8, %v4531_v9 }
0x10bd   : > { %v2967_v19 = vadd.f32 1e-05, %v2966_v18 }
0x10bf   : > { %4848 = vrsqrt.f32 %v2967_v19  ;;  %v4557_v19 = vcombine.low %v4523_v8, %v4531_v9 }
0x10c9   : > { %v4849_v41 = vpop.eup %4848 }
0x10ca   : > { %v2969_v21 = vmul.f32 %v4849_v41, %v2961_v50  ;;  %v4478_v50 = vld [vmem:[%s5835_s7 + $0x1e8] sm:$0xff] }
0x10cb   : > { %v4510_v54 = vcombine.high %v4470_v49, %v4478_v50  ;;  %v4509_v57 = vcombine.low %v4470_v49, %v4478_v50 }
0x10cc   : > { %v2976_v35 = vmul.f32 %v4447_v20, %v2969_v21  ;;  %v4539_v20 = vld [vmem:[%s5837_s9 + $0x180] sm:$0xff]  ;;  %v4540_v21 = vld [vmem:[%s5837_s9 + $0x188] sm:$0xff] }
0x10ce   : > { %v5574_v28 = vadd.f32 %v4448_v10, %v2976_v35  ;;  %v4548_v35 = vld [vmem:[%s5837_s9 + $0x1c8] sm:$0xff] }
0x10cf   : > { %v4575_v24 = vcombine.low %v4540_v21, %v4548_v35  ;;  %v4576_v25 = vcombine.high %v4540_v21, %v4548_v35 }
0x10d0   : > { %v5578_v29 = vpack.c.bf16 %v5574_v28, %v5574_v28 }
0x10d2   : > { %4515 = vmatmul.mubr.msk.bf16.vlgmr.msra.gmra.mrb[72].mxu0 %vm557_vm1, %v5578_v29  ;;  %4516 = vmatmul.mubr.msk.bf16.vlgmr.msra.gmra.mrb[72].mxu1 %vm557_vm1, %v5578_v29 }
0x10d3   : > { %3349 = vmatpush1.bf16.msra.mxu0 %v4487_v12  ;;  %3390 = vmatpush1.bf16.msra.mxu1 %v4489_v15  ;;  %v4532_v12 = vld [vmem:[%s5837_s9 + $0x148] sm:$0xff]  ;;  %v4511_v15 = vcombine.low %v4471_v58, %v4479_v62 }
0x10d4   : > { %3350 = vmatprep.subr.bf16.mxu0 %v4504_v30  ;;  %3391 = vmatprep.subr.bf16.mxu1 %v4506_v31  ;;  %v4560_v18 = vcombine.high %v4524_v11, %v4532_v12  ;;  %v4559_v41 = vcombine.low %v4524_v11, %v4532_v12  ;;  %v4526_v30 = vld [vmem:[%s5837_s9 + $0x118] sm:$0xff] }
0x10d5   : > { %3380 = vmatprep.mubr.bf16.mxu0 %v4880_v23  ;;  %3421 = vmatprep.mubr.bf16.mxu1 %v4880_v23  ;;  %v4563_v36 = vcombine.low %v4526_v30, %v4534_v32  ;;  %v4564_v37 = vcombine.high %v4526_v30, %v4534_v32  ;;  %v4528_v32 = vld [vmem:[%s5837_s9 + $0x128] sm:$0xff] }
0x10d7   : > { %3351 = vmatpush1.bf16.msra.mxu0 %v4503_v38  ;;  %3392 = vmatpush1.bf16.msra.mxu1 %v4505_v39  ;;  %v5689_v38 = vld [vmem:[%s5836_s8 + $0x10] sm:$0xff] }
0x10d8   : > { %3430 = vmatprep.subr.bf16.mxu0 %v4492_v40  ;;  %3471 = vmatprep.subr.bf16.mxu1 %v4494_v42  ;;  %v3026_v39 = vrot.slane %v5689_v38, %v5268_v44  ;;  %v3034_v40 = vrot.slane %v5689_v38, %v5270_v45  ;;  %v3030_v42 = vrot.slane %v5689_v38, %v5277_v47 }
0x10d9   : > { %v3038_v43 = vrot.slane %v5689_v38, %v5279_v48  ;;  %v3054_v8 = vrot.slane %v5689_v38, %v5291_v0  ;;  %v3050_v35 = vrot.slane %v5689_v38, %v5307_v14 }
0x10da   : > { %4517 = vmatmul.mubr.msk.bf16.vlgmr.msra.gmra.mrb[76].mxu0 %vm557_vm1, %v5578_v29  ;;  %4518 = vmatmul.mubr.msk.bf16.vlgmr.msra.gmra.mrb[76].mxu1 %vm557_vm1, %v5578_v29 }
0x10db   : > { %3431 = vmatpush1.bf16.msra.mxu0 %v4491_v51  ;;  %3472 = vmatpush1.bf16.msra.mxu1 %v4493_v52 }
0x10dc   : > { %3432 = vmatprep.subr.bf16.mxu0 %v4508_v53  ;;  %3473 = vmatprep.subr.bf16.mxu1 %v4510_v54 }
0x10dd   : > { %3462 = vmatprep.mubr.bf16.mxu0 %v4880_v23  ;;  %3503 = vmatprep.mubr.bf16.mxu1 %v4880_v23 }
0x10df   : > { %3433 = vmatpush1.bf16.msra.mxu0 %v4507_v60  ;;  %3474 = vmatpush1.bf16.msra.mxu1 %v4509_v57 }
0x10e0   : > { %3512 = vmatprep.subr.bf16.mxu0 %v4496_v33  ;;  %3553 = vmatprep.subr.bf16.mxu1 %v4498_v61  ;;  %v4541_v61 = vld [vmem:[%s5837_s9 + $0x190] sm:$0xff] }
0x10e1   : > { %v4578_v12 = vcombine.high %v4541_v61, %v4549_v2 }
0x10e2   : > { %4519 = vmatmul.mubr.msk.bf16.vlgmr.msra.gmra.mrb[80].mxu0 %vm557_vm1, %v5578_v29  ;;  %4520 = vmatmul.mubr.msk.bf16.vlgmr.msra.gmra.mrb[80].mxu1 %vm557_vm1, %v5578_v29 }
0x10e3   : > { %3513 = vmatpush1.bf16.msra.mxu0 %v4495_v5  ;;  %3554 = vmatpush1.bf16.msra.mxu1 %v4497_v6  ;;  %v4550_v5 = vld [vmem:[%s5837_s9 + $0x1d8] sm:$0xff] }
0x10e4   : > { %3514 = vmatprep.subr.bf16.mxu0 %v4512_v3  ;;  %3555 = vmatprep.subr.bf16.mxu1 %v4514_v7  ;;  %v3046_v7 = vrot.slane %v5689_v38, %v5289_v63 }
0x10e5   : > { %3544 = vmatprep.mubr.bf16.mxu0 %v4880_v23  ;;  %3585 = vmatprep.mubr.bf16.mxu1 %v4880_v23  ;;  %v4547_v23 = vld [vmem:[%s5837_s9 + $0x1c0] sm:$0xff] }
0x10e6   : > { %v4574_v10 = vcombine.high %v4539_v20, %v4547_v23  ;;  %v4573_v22 = vcombine.low %v4539_v20, %v4547_v23 }
0x10e7   : > { %3515 = vmatpush1.bf16.msra.mxu0 %v4511_v15  ;;  %3556 = vmatpush1.bf16.msra.mxu1 %v4513_v16  ;;  %v4580_v15 = vcombine.high %v4542_v4, %v4550_v5 }
0x10e8   : > { %3827 = vmatprep.subr.bf16.mxu0 %v4558_v17  ;;  %3867 = vmatprep.subr.bf16.mxu1 %v4560_v18 }
0x10ea   : > { %4521 = vmatmul.mubr.msk.bf16.vlgmr.msra.gmra.mrb[84].mxu0 %vm557_vm1, %v5578_v29  ;;  %4522 = vmatmul.mubr.msk.bf16.vlgmr.msra.gmra.mrb[84].mxu1 %vm557_vm1, %v5578_v29  ;;  %v4533_v29 = vld [vmem:[%s5837_s9 + $0x150] sm:$0xff] }
0x10eb   : > { %v4562_v31 = vcombine.high %v4525_v27, %v4533_v29  ;;  %v4561_v34 = vcombine.low %v4525_v27, %v4533_v29  ;;  %v4527_v27 = vld [vmem:[%s5837_s9 + $0x120] sm:$0xff] }
0x10f0   : > { %3828 = vmatpush1.bf16.xpose.msra.mxu0 %v4557_v19  ;;  %3868 = vmatpush1.bf16.xpose.msra.mxu1 %v4559_v41 }
0x10f1   : > { %3829 = vmatprep.subr.bf16.mxu0 %v4574_v10  ;;  %3869 = vmatprep.subr.bf16.mxu1 %v4576_v25  ;;  %v3042_v10 = vrot.slane %v5689_v38, %v5305_v13  ;;  %v5722_v25 = vld [vmem:[%s5836_s8 + $0x18] sm:$0xff] }
0x10f8   : > { %3830 = vmatpush1.bf16.xpose.msra.mxu0 %v4573_v22  ;;  %3870 = vmatpush1.bf16.xpose.msra.mxu1 %v4575_v24 }
0x10f9   : > { %3907 = vmatprep.subr.bf16.mxu0 %v4562_v31  ;;  %3947 = vmatprep.subr.bf16.mxu1 %v4564_v37  ;;  %v4535_v31 = vld [vmem:[%s5837_s9 + $0x160] sm:$0xff]  ;;  %v4579_v37 = vcombine.low %v4542_v4, %v4550_v5  ;;  %v4552_v4 = vld [vmem:[%s5837_s9 + $0x1e8] sm:$0xff] }
0x11a5   : > { %v3300_v46 = vpop.f32.mrb[72].mxu0  ;;  %v3341_v49 = vpop.f32.mrb[72].mxu1 }
0x11a6   : > { %v3301_v50 = vadd.f32 %v3300_v46, %v3026_v39  ;;  %v3342_v51 = vadd.f32 %v3341_v49, %v3034_v40  ;;  %v3302_v52 = vpop.f32.mrb[73].mxu0  ;;  %v3343_v53 = vpop.f32.mrb[73].mxu1  ;;  %v3062_v40 = vrot.slane %v5722_v25, %v5277_v47  ;;  %v4566_v49 = vcombine.high %v4527_v27, %v4535_v31 }
0x11a7   : > { %v3303_v54 = vadd.f32 %v3302_v52, %v3030_v42  ;;  %v3344_v26 = vadd.f32 %v3343_v53, %v3038_v43  ;;  %v3304_v55 = vpop.f32.mrb[74].mxu0  ;;  %v3345_v56 = vpop.f32.mrb[74].mxu1  ;;  %v3070_v42 = vrot.slane %v5722_v25, %v5279_v48 }
0x11a8   : > { %v3594_v59 = vmax.f32 %v3301_v50, 0.0  ;;  %v3596_v60 = vmax.f32 %v3342_v51, 0.0  ;;  %v3305_v57 = vpop.f32.mrb[75].mxu0  ;;  %v3346_v33 = vpop.f32.mrb[75].mxu1 }
0x11a9   : > { %v3595_v58 = vmax.f32 %v3303_v54, 0.0  ;;  %v3597_v62 = vmax.f32 %v3344_v26, 0.0 }
0x11aa   : > { %v3610_v9 = vpack.c.bf16 %v3594_v59, %v3594_v59  ;;  %v3612_v11 = vpack.c.bf16 %v3596_v60, %v3596_v60 }
0x11ab   : > { %v3611_v6 = vpack.c.bf16 %v3595_v58, %v3595_v58  ;;  %v3613_v3 = vpack.c.bf16 %v3597_v62, %v3597_v62  ;;  %v4543_v58 = vld [vmem:[%s5837_s9 + $0x1a0] sm:$0xff] }
0x11ac   : > { %v4551_v62 = vld [vmem:[%s5837_s9 + $0x1e0] sm:$0xff] }
0x11ad   : > { %v3382_v16 = vpop.f32.mrb[76].mxu0  ;;  %v3423_v17 = vpop.f32.mrb[76].mxu1  ;;  %3859 = vmatprep.mubr.bf16.mxu0 %v3611_v6  ;;  %3899 = vmatprep.mubr.bf16.mxu1 %v3613_v3  ;;  %v4565_v6 = vcombine.low %v4527_v27, %v4535_v31  ;;  %v3086_v27 = vrot.slane %v5722_v25, %v5291_v0  ;;  %v4553_v0 = vld [vmem:[%s5837_s9 + $0x1f0] sm:$0xff] }
0x11ae   : > { %v3384_v18 = vpop.f32.mrb[77].mxu0  ;;  %v3425_v19 = vpop.f32.mrb[77].mxu1  ;;  %3860 = vmatmul.mubr.bf16.vlgmr.msra.gmra.mrb[88].mxu0 %v3610_v9  ;;  %3900 = vmatmul.mubr.bf16.vlgmr.msra.gmra.mrb[88].mxu1 %v3612_v11  ;;  %v3383_v43 = vadd.f32 %v3382_v16, %v3042_v10  ;;  %v3424_v46 = vadd.f32 %v3423_v17, %v3050_v35  ;;  %v3066_v10 = vrot.slane %v5722_v25, %v5270_v45  ;;  %v4529_v35 = vld [vmem:[%s5837_s9 + $0x130] sm:$0xff]  ;;  %v4538_v45 = vld [vmem:[%s5837_s9 + $0x178] sm:$0xff] }
0x11af   : > { %v3385_v41 = vadd.f32 %v3384_v18, %v3046_v7  ;;  %v3426_v20 = vadd.f32 %v3425_v19, %v3054_v8  ;;  %3908 = vmatpush1.bf16.xpose.msra.mxu0 %v4561_v34  ;;  %3948 = vmatpush1.bf16.xpose.msra.mxu1 %v4563_v36  ;;  %v3386_v23 = vpop.f32.mrb[78].mxu0  ;;  %v3427_v21 = vpop.f32.mrb[78].mxu1  ;;  %v4536_v34 = vld [vmem:[%s5837_s9 + $0x168] sm:$0xff]  ;;  %v4577_v36 = vcombine.low %v4541_v61, %v4549_v2 }
0x11b0   : > { %v3387_v22 = vpop.f32.mrb[79].mxu0  ;;  %v3428_v24 = vpop.f32.mrb[79].mxu1  ;;  %3909 = vmatprep.subr.bf16.mxu0 %v4578_v12  ;;  %3949 = vmatprep.subr.bf16.mxu1 %v4580_v15  ;;  %v4568_v50 = vcombine.high %v4528_v32, %v4536_v34  ;;  %v3598_v47 = vmax.f32 %v3383_v43, 0.0  ;;  %v3600_v60 = vmax.f32 %v3424_v46, 0.0  ;;  %v4544_v2 = vld [vmem:[%s5837_s9 + $0x1a8] sm:$0xff]  ;;  %v4567_v9 = vcombine.low %v4528_v32, %v4536_v34 }
0x11b1   : > { %v3599_v29 = vmax.f32 %v3385_v41, 0.0  ;;  %v3601_v30 = vmax.f32 %v3426_v20, 0.0  ;;  %v4582_v15 = vcombine.high %v4543_v58, %v4551_v62  ;;  %v4584_v16 = vcombine.high %v4544_v2, %v4552_v4  ;;  %v4537_v22 = vld [vmem:[%s5837_s9 + $0x170] sm:$0xff]  ;;  %v4530_v24 = vld [vmem:[%s5837_s9 + $0x138] sm:$0xff] }
0x11b2   : > { %v3614_v3 = vpack.c.bf16 %v3598_v47, %v3598_v47  ;;  %v3616_v7 = vpack.c.bf16 %v3600_v60, %v3600_v60  ;;  %v3058_v20 = vrot.slane %v5722_v25, %v5268_v44  ;;  %v3078_v44 = vrot.slane %v5722_v25, %v5289_v63 }
0x11b3   : > { %v3615_v38 = vpack.c.bf16 %v3599_v29, %v3599_v29  ;;  %v3617_v39 = vpack.c.bf16 %v3601_v30, %v3601_v30  ;;  %v4581_v29 = vcombine.low %v4543_v58, %v4551_v62  ;;  %v4583_v31 = vcombine.low %v4544_v2, %v4552_v4 }
0x11b4   : > { %v4570_v32 = vcombine.high %v4529_v35, %v4537_v22  ;;  %v4569_v46 = vcombine.low %v4529_v35, %v4537_v22  ;;  %v3082_v47 = vrot.slane %v5722_v25, %v5307_v14  ;;  %v4556_v14 = vld [vmem:[%s5838_s10 + $0x1] ss:$0 sm:$0xff] }
0x11b5   : > { %v3464_v51 = vpop.f32.mrb[80].mxu0  ;;  %v3505_v52 = vpop.f32.mrb[80].mxu1  ;;  %3939 = vmatprep.mubr.bf16.mxu0 %v3615_v38  ;;  %3979 = vmatprep.mubr.bf16.mxu1 %v3617_v39 }
0x11b6   : > { %v3466_v53 = vpop.f32.mrb[81].mxu0  ;;  %v3507_v54 = vpop.f32.mrb[81].mxu1  ;;  %v3465_v30 = vadd.f32 %v3464_v51, %v3058_v20  ;;  %v3506_v34 = vadd.f32 %v3505_v52, %v3066_v10  ;;  %v4571_v52 = vcombine.low %v4530_v24, %v4538_v45 }
0x11b7   : > { %v3467_v26 = vadd.f32 %v3466_v53, %v3062_v40  ;;  %v3508_v55 = vadd.f32 %v3507_v54, %v3070_v42  ;;  %3910 = vmatpush1.bf16.xpose.msra.mxu0 %v4577_v36  ;;  %3950 = vmatpush1.bf16.xpose.msra.mxu1 %v4579_v37  ;;  %v3468_v56 = vpop.f32.mrb[82].mxu0  ;;  %v3509_v59 = vpop.f32.mrb[82].mxu1  ;;  %v4572_v36 = vcombine.high %v4530_v24, %v4538_v45  ;;  %v4545_v42 = vld [vmem:[%s5837_s9 + $0x1b0] sm:$0xff] }
0x11b8   : > { %v3469_v57 = vpop.f32.mrb[83].mxu0  ;;  %v3510_v48 = vpop.f32.mrb[83].mxu1  ;;  %3987 = vmatprep.subr.bf16.mxu0 %v4566_v49  ;;  %4027 = vmatprep.subr.bf16.mxu1 %v4568_v50  ;;  %v3602_v63 = vmax.f32 %v3465_v30, 0.0  ;;  %v3604_v39 = vmax.f32 %v3506_v34, 0.0  ;;  %v4546_v49 = vld [vmem:[%s5837_s9 + $0x1b8] sm:$0xff]  ;;  %v4586_v54 = vcombine.high %v4545_v42, %v4553_v0  ;;  %v3074_v59 = vrot.slane %v5722_v25, %v5305_v13 }
0x11b9   : > { %v3603_v33 = vmax.f32 %v3467_v26, 0.0  ;;  %v3605_v61 = vmax.f32 %v3508_v55, 0.0  ;;  %v4554_v50 = vld [vmem:[%s5837_s9 + $0x1f8] sm:$0xff]  ;;  %v4585_v60 = vcombine.low %v4545_v42, %v4553_v0 }
0x11ba   : > { %v3618_v51 = vpack.c.bf16 %v3602_v63, %v3602_v63  ;;  %v3620_v53 = vpack.c.bf16 %v3604_v39, %v3604_v39  ;;  %v4588_v55 = vcombine.high %v4546_v49, %v4554_v50  ;;  %v4587_v48 = vcombine.low %v4546_v49, %v4554_v50 }
0x11bb   : > { %v3619_v5 = vpack.c.bf16 %v3603_v33, %v3603_v33  ;;  %v3621_v8 = vpack.c.bf16 %v3605_v61, %v3605_v61 }
0x11bd   : > { %v5752_v11 = vpop.f32.mrb[84].mxu0  ;;  %v5754_v12 = vpop.f32.mrb[84].mxu1 }
0x11be   : > { %3940 = vmatmul.mubr.bf16.vlgmr.msra.gmra.mrb[92].mxu0 %v3614_v3  ;;  %3980 = vmatmul.mubr.bf16.vlgmr.msra.gmra.mrb[92].mxu1 %v3616_v7  ;;  %v3548_v17 = vpop.f32.mrb[85].mxu0  ;;  %v3589_v18 = vpop.f32.mrb[85].mxu1  ;;  %v3547_v57 = vadd.f32 %v5752_v11, %v3074_v59  ;;  %v3588_v33 = vadd.f32 %v5754_v12, %v3082_v47  ;;  %v4592_v47 = vld [vmem:[%s5840_s12 + $0x1] ss:$0 sm:$0xff] }
0x11bf   : > { %3988 = vmatpush1.bf16.xpose.msra.mxu0 %v4565_v6  ;;  %4019 = vmatprep.mubr.bf16.mxu0 %v3619_v5  ;;  %v3550_v19 = vpop.f32.mrb[86].mxu0  ;;  %v3591_v41 = vpop.f32.mrb[86].mxu1  ;;  %v3549_v37 = vadd.f32 %v3548_v17, %v3078_v44  ;;  %v3590_v38 = vadd.f32 %v3589_v18, %v3086_v27 }
0x11c0   : > { %4028 = vmatpush1.bf16.xpose.msra.mxu1 %v4567_v9  ;;  %4059 = vmatprep.mubr.bf16.mxu1 %v3621_v8  ;;  %v3551_v23 = vpop.f32.mrb[87].mxu0  ;;  %v3592_v21 = vpop.f32.mrb[87].mxu1  ;;  %v3606_v61 = vmax.f32 %v3547_v57, 0.0  ;;  %v3608_v13 = vmax.f32 %v3588_v33, 0.0 }
0x11c1   : > { %3989 = vmatprep.subr.bf16.mxu0 %v4582_v15  ;;  %4029 = vmatprep.subr.bf16.mxu1 %v4584_v16  ;;  %v3607_v40 = vmax.f32 %v3549_v37, 0.0  ;;  %v3609_v43 = vmax.f32 %v3590_v38, 0.0 }
0x11c2   : > { %v3622_v58 = vpack.c.bf16 %v3606_v61, %v3606_v61  ;;  %v3624_v62 = vpack.c.bf16 %v3608_v13, %v3608_v13  ;;  %v4180_v61 = vld [vmem:[%s5841_s13] sm:$0x1] }
0x11c3   : > { %v3623_v26 = vpack.c.bf16 %v3607_v40, %v3607_v40  ;;  %v3625_v56 = vpack.c.bf16 %v3609_v43, %v3609_v43 }
0x11c7   : > { %3990 = vmatpush1.bf16.xpose.msra.mxu0 %v4581_v29 }
0x11c8   : > { %4030 = vmatpush1.bf16.xpose.msra.mxu1 %v4583_v31  ;;  %4067 = vmatprep.subr.bf16.mxu0 %v4570_v32 }
0x11c9   : > { %4107 = vmatprep.subr.bf16.mxu1 %v4572_v36 }
0x11ce   : > { %4020 = vmatmul.mubr.bf16.vlgmr.msra.gmra.mrb[96].mxu0 %v3618_v51 }
0x11cf   : > { %4060 = vmatmul.mubr.bf16.vlgmr.msra.gmra.mrb[96].mxu1 %v3620_v53  ;;  %4068 = vmatpush1.bf16.xpose.msra.mxu0 %v4569_v46  ;;  %v4181_v53 = vld [vmem:[%s5842_s14] sm:$0x3] }
0x11d0   : > { %4099 = vmatprep.mubr.bf16.mxu0 %v3623_v26  ;;  %4108 = vmatpush1.bf16.xpose.msra.mxu1 %v4571_v52 }
0x11d1   : > { %4139 = vmatprep.mubr.bf16.mxu1 %v3625_v56  ;;  %4069 = vmatprep.subr.bf16.mxu0 %v4586_v54  ;;  %v4591_v56 = vld [vmem:[%s5839_s11 + $0x1] ss:$0 sm:$0xff] }
0x11d2   : > { %4109 = vmatprep.subr.bf16.mxu1 %v4588_v55  ;;  %4184 = vperm.xlu1 %4802, %v4181_v53  }
0x11d7   : > { %4070 = vmatpush1.bf16.xpose.msra.mxu0 %v4585_v60 }
0x11d8   : > { %4110 = vmatpush1.bf16.xpose.msra.mxu1 %v4587_v48  ;;  %4771 = vmatprep.subr.bf16.mxu0 %v4864_v1 }
0x11de   : > { %4100 = vmatmul.mubr.bf16.vlgmr.msra.gmra.mrb[100].mxu0 %v3622_v58 }
0x11df   : > { %4140 = vmatmul.mubr.bf16.vlgmr.msra.gmra.mrb[100].mxu1 %v3624_v62  ;;  %4773 = vmatprep.mubr.msk.bf16.mxu0 %vm4865_vm0, %v4864_v1 }
0x1251   : > { %v4185_v13 = vpop.permute.xlu1 %4184 }
0x1281   : > { %v3861_v25 = vpop.f32.mrb[88].mxu0  ;;  %v3901_v2 = vpop.f32.mrb[88].mxu1 }
0x1282   : > { %v3862_v4 = vadd.f32 %v4556_v14, %v3861_v25  ;;  %v3863_v5 = vpop.f32.mrb[89].mxu0  ;;  %v3903_v6 = vpop.f32.mrb[89].mxu1 }
0x1283   : > { %v3864_v3 = vpop.f32.mrb[90].mxu0  ;;  %v3904_v7 = vpop.f32.mrb[90].mxu1  ;;  %v4594_v5 = vld [vmem:[%s526_s30] ss:$0 sm:$0xff] }
0x1284   : > { %v3902_v8 = vadd.f32 %v3901_v2, %v3862_v4  ;;  %v3865_v9 = vpop.f32.mrb[91].mxu0  ;;  %v3905_v11 = vpop.f32.mrb[91].mxu1 }
0x1291   : > { %v3941_v12 = vpop.f32.mrb[92].mxu0  ;;  %v3981_v15 = vpop.f32.mrb[92].mxu1 }
0x1292   : > { %v3942_v16 = vadd.f32 %v3941_v12, %v3902_v8  ;;  %v3943_v17 = vpop.f32.mrb[93].mxu0  ;;  %v3983_v18 = vpop.f32.mrb[93].mxu1 }
0x1293   : > { %v3944_v1 = vpop.f32.mrb[94].mxu0  ;;  %v3984_v19 = vpop.f32.mrb[94].mxu1 }
0x1294   : > { %v3982_v41 = vadd.f32 %v3981_v15, %v3942_v16  ;;  %v3945_v20 = vpop.f32.mrb[95].mxu0  ;;  %v3985_v23 = vpop.f32.mrb[95].mxu1 }
0x12a1   : > { %v4021_v21 = vpop.f32.mrb[96].mxu0 }
0x12a2   : > { %v4022_v10 = vadd.f32 %v4021_v21, %v3982_v41  ;;  %v4061_v35 = vpop.f32.mrb[96].mxu1  ;;  %v4023_v22 = vpop.f32.mrb[97].mxu0 }
0x12a3   : > { %v4063_v44 = vpop.f32.mrb[97].mxu1  ;;  %v4024_v24 = vpop.f32.mrb[98].mxu0 }
0x12a4   : > { %v4062_v45 = vadd.f32 %v4061_v35, %v4022_v10  ;;  %v4064_v27 = vpop.f32.mrb[98].mxu1  ;;  %v4025_v29 = vpop.f32.mrb[99].mxu0 }
0x12a5   : > { %v4065_v30 = vpop.f32.mrb[99].mxu1 }
0x12b1   : > { %v4101_v31 = vpop.f32.mrb[100].mxu0 }
0x12b2   : > { %v4102_v32 = vadd.f32 %v4101_v31, %v4062_v45  ;;  %v4141_v34 = vpop.f32.mrb[100].mxu1  ;;  %v4103_v36 = vpop.f32.mrb[101].mxu0 }
0x12b3   : > { %v4143_v37 = vpop.f32.mrb[101].mxu1  ;;  %v4104_v38 = vpop.f32.mrb[102].mxu0 }
0x12b4   : > { %v4142_v63 = vadd.f32 %v4141_v34, %v4102_v32  ;;  %v4144_v39 = vpop.f32.mrb[102].mxu1  ;;  %v4105_v40 = vpop.f32.mrb[103].mxu0 }
0x12b5   : > { %v4145_v42 = vpop.f32.mrb[103].mxu1 }
0x12b6   : > { %v4147_v0 = vadd.f32 %v4142_v63, %v5574_v28 }
0x12b8   : > { %v4152_v43 = vsel %vm557_vm1, %v4147_v0, 0.0 }
0x12b9   : > { %4153 = vadd.xlane.f32.xlu0 %v4152_v43 }
0x1346   : > { %v4154_v46 = vpop.xlane.xlu0 %4153 }
0x1347   : > { %v4155_v49 = vmul.f32 0.03125, %v4154_v46 }
0x1349   : > { %v4156_v50 = vsub.f32 %v4147_v0, %v4155_v49 }
0x134b   : > { %v4157_v51 = vmul.f32 %v4156_v50, %v4156_v50 }
0x134d   : > { %v4158_v52 = vsel %vm557_vm1, %v4157_v51, 0.0 }
0x134e   : > { %4159 = vadd.xlane.f32.xlu0 %v4158_v52 }
0x13db   : > { %v4160_v54 = vpop.xlane.xlu0 %4159 }
0x13dc   : > { %v4161_v26 = vmul.f32 0.03125, %v4160_v54 }
0x13de   : > { %v4162_v55 = vadd.f32 1e-05, %v4161_v26 }
0x13e0   : > { %4850 = vrsqrt.f32 %v4162_v55 }
0x13ea   : > { %v4851_v28 = vpop.eup %4850 }
0x13eb   : > { %v4164_v59 = vmul.f32 %v4851_v28, %v4156_v50 }
0x13ed   : > { %v4171_v60 = vmul.f32 %v4591_v56, %v4164_v59 }
0x13ef   : > { %v4178_v57 = vadd.f32 %v4592_v47, %v4171_v60 }
0x13f1   : > { %v4179_v48 = vpack.c.bf16 %v4178_v57, %v4178_v57 }
0x13f3   : > { %v4191_v33 = vsel %vm557_vm1, %v4179_v48, 0 }
0x13f4   : > { %4772 = vmatpush3.bf16.xpose.msra.mxu0 %v4191_v33 }
0x13fb   : > { %4774 = vmatmul.mubr.msk.bf16.vlgmr.msra.gmra.mrb[104].mxu0 %vm557_vm1, %v4180_v61 }
0x14ce   : > { %v4227_v58 = vpop.f32.mrb[104].mxu0 }
0x14cf   : > { %v4228_v62 = vadd.f32 %v4227_v58, %v4185_v13  ;;  %v4775_v14 = vpop.f32.mrb[105].mxu0 }
0x14d0   : > { %v4230_v25 = vpop.f32.mrb[106].mxu0 }
0x14d1   : > { %v4233_v2 = vmul.f32 1.442695, %v4228_v62  ;;  %v4776_v4 = vpop.f32.mrb[107].mxu0 }
0x14d3   : > { %4852 = vpow2.f32 %v4233_v2 }
0x14dd   : > { %v4853_v6 = vpop.eup %4852 }
0x14de   : > { %v4242_v3 = vmul.f32 %v4853_v6, %v4594_v5  ;;  %v4252_v12 = vsel %vm4251_vm6, %v4228_v62, %v4853_v6 }
0x14e0   : > { %v4244_v7 = vrot.slane %v4242_v3, 1 }
0x14e2   : > { %v4246_v8 = vadd.f32 %v4244_v7, %v4228_v62 }
0x14e4   : > { %4854 = vtanh.f32 %v4246_v8 }
0x14ee   : > { %v4855_v9 = vpop.eup %4854 }
0x14ef   : > { %v4249_v11 = vrot.slane %v4855_v9, 6 }
0x14f1   : > { %v4254_v15 = vsel %vm4253_vm7, %v4252_v12, %v4249_v11 }
0x14f2   : > { %4256 = vst.msk [vmem:[%s530_s28] sm:$0x7] %vm4255_vm8, %v4254_v15 }
0x14f3 PF: > { %s26_s21 = sadd.s32 1, %s4862_s21  }
0x14f4   : > { %p23_p4 = scmp.ge.s32.totalorder %s26_s21, 4  }
0x14f6   :  { %25 = sbr.rel (!%p23_p4) target bundleno = 2 (0x2), region = 129 }

</bundles_post_ra>
